<compile_context>
chip_gen: v5e
topology: v5e:2x2
jax: 0.10.0
libtpu: 0.0.40
codegen_flags: <defaults>
</compile_context>

<pallas_src>
import math

import jax
import jax.numpy as jnp
from jax.experimental import pallas as pl
from jax.experimental.pallas import tpu as pltpu

PI = math.pi

# ------------------------- NEP hyper parameters (small) -------------------------
NTYPES = 2
MAX_NEIGH = 4
MAX_NEIGH_TYPE = NTYPES * MAX_NEIGH          # neighbor slots per atom (= list_neigh.shape[2])
MT = MAX_NEIGH_TYPE
CUTOFF_RADIAL = 6.0
CUTOFF_ANGULAR = 4.0
RCINV_R = 1.0 / CUTOFF_RADIAL
RCINV_A = 1.0 / CUTOFF_ANGULAR
N_MAX_RADIAL = 3
N_BASE_RADIAL = 5
N_MAX_ANGULAR = 2
N_BASE_ANGULAR = 3
L_MAX_3B = 4                                  # C3B has 24 entries -> l = 1..4
NEURON = 32
TWO_FEAT = N_MAX_RADIAL + 1
THREE_FEAT = (N_MAX_ANGULAR + 1) * L_MAX_3B
FEATURE_NUMS = TWO_FEAT + THREE_FEAT          # l_max_4b = l_max_5b = 0 in this config
F_EFF = TWO_FEAT + L_MAX_3B                   # replicated 3-body columns folded into w1

STACK_ROWS = ((4 * MT + 1 + 7) // 8) * 8      # R,X,Y,Z planes + type row, padded to x8 -> 40
TA = 256                                      # lane tile (atoms); VALU-bound -> keep tiles small

C3B = [
    0.238732414637843, 0.119366207318922, 0.119366207318922, 0.099471839432435,
    0.596831036594608, 0.596831036594608, 0.149207759148652, 0.149207759148652,
    0.139260575205408, 0.104445431404056, 0.104445431404056, 1.044454314040563,
    1.044454314040563, 0.174075719006761, 0.174075719006761, 0.011190581936149,
    0.223811638722978, 0.223811638722978, 0.111905819361489, 0.111905819361489,
    1.566681471060845, 1.566681471060845, 0.195835183882606, 0.195835183882606,
]


# ----------------------------- in-kernel helpers --------------------------------
def _cheb_fk(rij, n_base, rcut, rcinv):
    """Cutoff fn * Chebyshev basis: fk[0..n_base], each (MT, TA).

    Only the cutoff function carries the mask (in the reference every term is multiplied by
    fc which is 0 outside the cutoff / for padded slots, so the extra selects are redundant)."""
    mask = (jnp.abs(rij) > 1e-5) & (rij <= rcut)
    fc = jnp.where(mask, 0.5 + 0.5 * jnp.cos(PI * rij * rcinv), 0.0)
    x = 2.0 * (rij * rcinv - 1.0) ** 2 - 1.0
    fk = [fc, 0.5 * (x + 1.0) * fc]
    tkm2 = jnp.ones_like(rij)
    tkm1 = x
    for _ in range(2, n_base + 1):
        tkn = 2.0 * x * tkm1 - tkm2
        fk.append(0.5 * (tkn + 1.0) * fc)
        tkm2, tkm1 = tkm1, tkn
    return fk


# ------------------------------- fused kernel ------------------------------------
def nep_fused_kernel(stk_ref, cslot_ref, w1a_ref, w1b_ref, b1_ref, w2_ref, b2_ref, ei_ref):
    rij = stk_ref[0 * MT:1 * MT, :]                       # (MT, TA), atoms on lanes
    xx = stk_ref[1 * MT:2 * MT, :]
    yy = stk_ref[2 * MT:3 * MT, :]
    zz = stk_ref[3 * MT:4 * MT, :]
    tf1 = stk_ref[4 * MT:4 * MT + 1, :]                   # (1, TA): 0. -> type0, 1. -> type1
    tf0 = 1.0 - tf1

    # ---- 2-body (radial) features: ONE (8,48)@(48,TA) MXU contraction ----
    fk_r = _cheb_fk(rij, N_BASE_RADIAL, CUTOFF_RADIAL, RCINV_R)
    fk_cat = jnp.concatenate(fk_r, axis=0)                # (48, TA), aligned sublane concat
    feat2_all = jnp.dot(cslot_ref[...], fk_cat,
                        preferred_element_type=jnp.float32)            # (8, TA)
    feat2 = tf0 * feat2_all[0:TWO_FEAT, :] + tf1 * feat2_all[TWO_FEAT:2 * TWO_FEAT, :]

    # ---- 3-body (angular) radial weight: closed-form gn1 = fc*(2.5 + 0.5*(T1+T2+T3)) ----
    mask_a = (jnp.abs(rij) > 1e-5) & (rij <= CUTOFF_ANGULAR)
    fc_a = jnp.where(mask_a, 0.5 + 0.5 * jnp.cos(PI * rij * RCINV_A), 0.0)
    xa = 2.0 * (rij * RCINV_A - 1.0) ** 2 - 1.0
    t2 = 2.0 * xa * xa - 1.0
    t3 = 2.0 * xa * t2 - xa
    gn1 = fc_a * (2.5 + 0.5 * (xa + t2 + t3))

    # guarded 1/r on the EUP (approx reciprocal + one Newton step; padding-safe)
    rmask = jnp.abs(rij) > 1e-5
    rcp = pl.reciprocal(rij, approx=True)
    rcp = rcp * (2.0 - rij * rcp)
    inv_r = jnp.where(rmask, rcp, 0.0)

    # ---- 24 blm terms folded into 4 l-group weights (equal-coefficient pairs pre-summed) ----
    x12 = inv_r * xx
    y12 = inv_r * yy
    z12 = inv_r * zz
    x2 = x12 * x12
    y2 = y12 * y12
    z2 = z12 * z12
    xy = x12 * y12
    s = x12 + y12
    v = 2.0 * xy
    u = x2 - y2
    p = u + v                                              # blm6 + blm7
    zs = z12 * s
    f5 = 5.0 * z2
    f7 = 7.0 * z2
    t34 = (x2 - 3.0 * y2) * x12 + (3.0 * x2 - y2) * y12    # blm13 + blm14

    w0 = C3B[0] * z12 + C3B[1] * s
    w1g = C3B[3] * (3.0 * z2 - 1.0) + C3B[4] * zs + C3B[6] * p
    w2g = (C3B[8] * ((f5 - 3.0) * z12) + C3B[9] * ((f5 - 1.0) * s)
           + C3B[11] * (z12 * p) + C3B[13] * t34)
    w3g = (C3B[15] * ((35.0 * z2 - 30.0) * z2 + 3.0)
           + C3B[16] * ((f7 - 3.0) * zs)
           + C3B[18] * ((f7 - 1.0) * p)
           + C3B[20] * (z12 * t34)
           + C3B[22] * (p * p - 2.0 * (v * v)))

    # (32, TA) stack of per-slot 3-body contributions; the neighbor-slot sum is folded into w1b.
    q3 = jnp.concatenate([gn1 * w0, gn1 * w1g, gn1 * w2g, gn1 * w3g], axis=0)

    # ---- fused per-type FittingNet (tanh MLP + energy shift), packed matmuls ----
    hidden = jnp.tanh(
        jnp.dot(w1a_ref[...], feat2, preferred_element_type=jnp.float32)
        + jnp.dot(w1b_ref[...], q3, preferred_element_type=jnp.float32)
        + b1_ref[...]
    )                                                      # (2*NEURON, TA)
    e_all = jnp.dot(w2_ref[...], hidden, preferred_element_type=jnp.float32) + b2_ref[...]
    ei_ref[...] = tf0 * e_all[0:1, :] + tf1 * e_all[1:2, :]


# ----------------------------------- wrapper -------------------------------------
def nep_forward(list_neigh, imagetype_map, atom_type, image_dr, params):
    del atom_type  # get_train_2body_type: all types present -> identity mapping here
    B, N, mt = list_neigh.shape
    assert mt == MT
    A = B * N
    f32 = jnp.float32

    A_pad = ((A + TA - 1) // TA) * TA
    # NOTE: padded atom lanes get rij=0 -> fc=0 -> features 0; their (nonzero) Ei is sliced off
    # below BEFORE any reduction. Never sum ei_pad directly.

    # ---- single stacked input: rows [R(8); X(8); Y(8); Z(8); type(1); zeros(7)] ----
    dr = image_dr.astype(f32).reshape(A, MT, 4)
    planes = jnp.transpose(dr, (2, 1, 0)).reshape(4 * MT, A)         # (32, A)
    tf = jnp.tile(imagetype_map.astype(f32), B).reshape(1, A)
    stacked = jnp.concatenate([planes, tf], axis=0)                  # (33, A)
    stacked = jnp.pad(stacked, ((0, STACK_ROWS - (4 * MT + 1)), (0, A_pad - A)))

    # ---- pack the tiny c table into a single (8, 48) matrix (orders along K) ----
    # cslot2d[t*(NMR+1)+n, k*MT + j] = c_param_2[t, type(j), n, k]
    c2 = params["c_param_2"].astype(f32)                             # (T, T, NMR+1, KR+1)
    c_tn = jnp.transpose(c2, (0, 2, 1, 3))                           # (T, NMR+1, T, KR+1)
    c_slots = c_tn[:, :, params["j_list"], :]                        # (T, NMR+1, MT, KR+1)
    cslot2d = jnp.transpose(c_slots, (0, 1, 3, 2)).reshape(
        NTYPES * TWO_FEAT, (N_BASE_RADIAL + 1) * MT)                 # (8, 48)

    # ---- fold replicated 3-body columns (and the neighbor-slot sum) into w1; pack nets ----
    w1 = params["w1"].astype(f32)                                    # (T, FEATURE_NUMS, H)
    w3b = w1[:, TWO_FEAT:, :].reshape(
        NTYPES, N_MAX_ANGULAR + 1, L_MAX_3B, NEURON).sum(axis=1)     # fold n replication
    w1_eff = jnp.concatenate([w1[:, :TWO_FEAT, :], w3b], axis=1)     # (T, F_EFF, H)
    w1p = jnp.transpose(w1_eff, (0, 2, 1)).reshape(NTYPES * NEURON, F_EFF)
    w1a = w1p[:, :TWO_FEAT]                                          # (64, 4)
    w1b = jnp.repeat(w1p[:, TWO_FEAT:], MT, axis=1)                  # (64, 32): slot-sum folded in
    b1p = params["b1"].astype(f32).reshape(NTYPES * NEURON, 1)
    w2sq = params["w2"].astype(f32)[:, :, 0]                         # (T, H)
    eye = jnp.eye(NTYPES, dtype=f32)
    w2p = (eye[:, :, None] * w2sq[None, :, :]).reshape(NTYPES, NTYPES * NEURON)
    b2p = params["b2"].astype(f32).reshape(NTYPES, 1)                # per-type energy shift

    const = lambda i: (0, 0)
    ei_pad = pl.pallas_call(
        nep_fused_kernel,
        out_shape=jax.ShapeDtypeStruct((1, A_pad), f32),
        grid=(A_pad // TA,),
        in_specs=[
            pl.BlockSpec((STACK_ROWS, TA), lambda i: (0, i)),                 # fused R/X/Y/Z/type
            pl.BlockSpec((NTYPES * TWO_FEAT, (N_BASE_RADIAL + 1) * MT), const),  # cslot2d
            pl.BlockSpec((NTYPES * NEURON, TWO_FEAT), const),                 # w1 (2-body part)
            pl.BlockSpec((NTYPES * NEURON, L_MAX_3B * MT), const),            # w1 (3-body, slot-rep)
            pl.BlockSpec((NTYPES * NEURON, 1), const),                        # b1 packed
            pl.BlockSpec((NTYPES, NTYPES * NEURON), const),                   # w2 block-diag
            pl.BlockSpec((NTYPES, 1), const),                                 # energy shift
        ],
        out_specs=pl.BlockSpec((1, TA), lambda i: (0, i)),
        compiler_params=pltpu.CompilerParams(
            dimension_semantics=("parallel",)),
    )(stacked, cslot2d, w1a, w1b, b1p, w2p, b2p)

    Ei = ei_pad[0, :A].reshape(B, N)                                 # squeeze(-1) equivalent
    Etot = jnp.sum(Ei, axis=1, keepdims=True)                        # torch.sum(Ei, 1) on (B, N, 1)
    Force, Egroup, Virial = None, None, None
    return Etot, Ei, Force, Egroup, Virial


# ------------------------------------ main ----------------------------------------
if __name__ == "__main__":
    B, N = 2, 8
    key = jax.random.PRNGKey(0)
    k1, k2, k3, k4, k5, k6, k7 = jax.random.split(key, 7)

    # inputs (list_neigh, Imagetype_map, atom_type, ImageDR)
    rij = jax.random.uniform(k1, (B, N, MT), minval=0.6, maxval=1.3 * CUTOFF_RADIAL)
    dirs = jax.random.normal(k2, (B, N, MT, 3))
    dirs = dirs / jnp.linalg.norm(dirs, axis=-1, keepdims=True)
    image_dr = jnp.concatenate([rij[..., None], dirs * rij[..., None]], axis=-1)
    image_dr = image_dr.astype(jnp.float32)                          # (B, N, MT, 4)
    list_neigh = jax.random.randint(k3, (B, N, MT), 1, N + 1)
    imagetype_map = jnp.array([0, 0, 0, 0, 1, 1, 1, 1], dtype=jnp.int32)
    atom_type = jnp.array([3, 14], dtype=jnp.int32)

    # parameters (deterministic init, shapes from NEP.__init__ / set_init_nep_param)
    two_c_num = NTYPES * NTYPES * (N_MAX_RADIAL + 1) * (N_BASE_RADIAL + 1)
    r_k = jax.random.normal(k4, (two_c_num,))
    m = jax.random.uniform(k5, (two_c_num,)) - 0.5
    c_param_2 = (m + 0.1 * r_k).reshape(
        NTYPES, NTYPES, N_MAX_RADIAL + 1, N_BASE_RADIAL + 1
    ).astype(jnp.float32)
    j_list = jnp.array(
        [t for t in range(NTYPES) for _ in range(MAX_NEIGH)], dtype=jnp.int32
    )
    energy_shift = jnp.array([-3.37, -5.51], dtype=jnp.float32)
    params = {
        "c_param_2": c_param_2,
        "j_list": j_list,
        "w1": (0.1 * jax.random.normal(k6, (NTYPES, FEATURE_NUMS, NEURON))).astype(jnp.float32),
        "b1": jnp.zeros((NTYPES, 1, NEURON), jnp.float32),
        "w2": (0.1 * jax.random.normal(k7, (NTYPES, NEURON, 1))).astype(jnp.float32),
        "b2": energy_shift.reshape(NTYPES, 1),
    }

    Etot, Ei, Force, Egroup, Virial = nep_forward(
        list_neigh, imagetype_map, atom_type, image_dr, params
    )
    jax.block_until_ready((Etot, Ei))
    assert Etot.shape == (B, 1) and Ei.shape == (B, N)
    assert bool(jnp.all(jnp.isfinite(Etot))) and bool(jnp.all(jnp.isfinite(Ei)))
    print("KERNEL_OK")
</pallas_src>

<mosaic_0001>
module attributes {stable_mosaic.version = 11 : i64} {
  func.func @nep_fused_kernel(%arg0: i32, %arg1: memref<40x256xf32, #tpu.memory_space<vmem>>, %arg2: memref<8x48xf32, #tpu.memory_space<vmem>>, %arg3: memref<64x4xf32, #tpu.memory_space<vmem>>, %arg4: memref<64x32xf32, #tpu.memory_space<vmem>>, %arg5: memref<64x1xf32, #tpu.memory_space<vmem>>, %arg6: memref<2x64xf32, #tpu.memory_space<vmem>>, %arg7: memref<2x1xf32, #tpu.memory_space<vmem>>, %arg8: memref<1x256xf32, #tpu.memory_space<vmem>>) attributes {dimension_semantics = [#tpu.dimension_semantics<parallel>], iteration_bounds = array<i64: 1>, scalar_prefetch = 0 : i64, scratch_operands = 0 : i64, tpu.core_type = #tpu.core_type<tc>, window_params = [{transform_indices = @transform_0, window_bounds = array<i64: 40, 256>}, {pipeline_mode = #tpu.pipeline_mode<synchronous>, transform_indices = @transform_1, window_bounds = array<i64: 8, 48>}, {pipeline_mode = #tpu.pipeline_mode<synchronous>, transform_indices = @transform_2, window_bounds = array<i64: 64, 4>}, {pipeline_mode = #tpu.pipeline_mode<synchronous>, transform_indices = @transform_3, window_bounds = array<i64: 64, 32>}, {pipeline_mode = #tpu.pipeline_mode<synchronous>, transform_indices = @transform_4, window_bounds = array<i64: 64, 1>}, {pipeline_mode = #tpu.pipeline_mode<synchronous>, transform_indices = @transform_5, window_bounds = array<i64: 2, 64>}, {pipeline_mode = #tpu.pipeline_mode<synchronous>, transform_indices = @transform_6, window_bounds = array<i64: 2, 1>}, {transform_indices = @transform_7, window_bounds = array<i64: 1, 256>}]} {
    %c0 = arith.constant 0 : index
    %c0_0 = arith.constant 0 : index
    %0 = vector.load %arg1[%c0, %c0_0] : memref<40x256xf32, #tpu.memory_space<vmem>>, vector<8x256xf32>
    %c8 = arith.constant 8 : index
    %c0_1 = arith.constant 0 : index
    %1 = vector.load %arg1[%c8, %c0_1] : memref<40x256xf32, #tpu.memory_space<vmem>>, vector<8x256xf32>
    %c16 = arith.constant 16 : index
    %c0_2 = arith.constant 0 : index
    %2 = vector.load %arg1[%c16, %c0_2] : memref<40x256xf32, #tpu.memory_space<vmem>>, vector<8x256xf32>
    %c24 = arith.constant 24 : index
    %c0_3 = arith.constant 0 : index
    %3 = vector.load %arg1[%c24, %c0_3] : memref<40x256xf32, #tpu.memory_space<vmem>>, vector<8x256xf32>
    %c32 = arith.constant 32 : index
    %c0_4 = arith.constant 0 : index
    %4 = vector.load %arg1[%c32, %c0_4] : memref<40x256xf32, #tpu.memory_space<vmem>>, vector<1x256xf32>
    %cst = arith.constant 1.000000e+00 : f32
    %5 = vector.broadcast %cst : f32 to vector<1x256xf32>
    %6 = arith.subf %5, %4 : vector<1x256xf32>
    %7 = math.absf %0 : vector<8x256xf32>
    %cst_5 = arith.constant 9.99999974E-6 : f32
    %8 = vector.broadcast %cst_5 : f32 to vector<8x256xf32>
    %9 = arith.cmpf ogt, %7, %8 : vector<8x256xf32>
    %cst_6 = arith.constant 6.000000e+00 : f32
    %10 = vector.broadcast %cst_6 : f32 to vector<8x256xf32>
    %11 = arith.cmpf ole, %0, %10 : vector<8x256xf32>
    %12 = arith.andi %9, %11 : vector<8x256xi1>
    %cst_7 = arith.constant 3.14159274 : f32
    %13 = vector.broadcast %cst_7 : f32 to vector<8x256xf32>
    %14 = arith.mulf %13, %0 : vector<8x256xf32>
    %cst_8 = arith.constant 0.166666672 : f32
    %15 = vector.broadcast %cst_8 : f32 to vector<8x256xf32>
    %16 = arith.mulf %14, %15 : vector<8x256xf32>
    %17 = math.cos %16 : vector<8x256xf32>
    %cst_9 = arith.constant 5.000000e-01 : f32
    %18 = vector.broadcast %cst_9 : f32 to vector<8x256xf32>
    %19 = arith.mulf %18, %17 : vector<8x256xf32>
    %cst_10 = arith.constant 5.000000e-01 : f32
    %20 = vector.broadcast %cst_10 : f32 to vector<8x256xf32>
    %21 = arith.addf %20, %19 : vector<8x256xf32>
    %cst_11 = arith.constant 0.000000e+00 : f32
    %22 = vector.broadcast %cst_11 : f32 to vector<8x256xf32>
    %23 = arith.select %12, %21, %22 : vector<8x256xi1>, vector<8x256xf32>
    %cst_12 = arith.constant 0.166666672 : f32
    %24 = vector.broadcast %cst_12 : f32 to vector<8x256xf32>
    %25 = arith.mulf %0, %24 : vector<8x256xf32>
    %cst_13 = arith.constant 1.000000e+00 : f32
    %26 = vector.broadcast %cst_13 : f32 to vector<8x256xf32>
    %27 = arith.subf %25, %26 : vector<8x256xf32>
    %28 = arith.mulf %27, %27 : vector<8x256xf32>
    %cst_14 = arith.constant 2.000000e+00 : f32
    %29 = vector.broadcast %cst_14 : f32 to vector<8x256xf32>
    %30 = arith.mulf %29, %28 : vector<8x256xf32>
    %cst_15 = arith.constant 1.000000e+00 : f32
    %31 = vector.broadcast %cst_15 : f32 to vector<8x256xf32>
    %32 = arith.subf %30, %31 : vector<8x256xf32>
    %cst_16 = arith.constant 1.000000e+00 : f32
    %33 = vector.broadcast %cst_16 : f32 to vector<8x256xf32>
    %34 = arith.addf %32, %33 : vector<8x256xf32>
    %cst_17 = arith.constant 5.000000e-01 : f32
    %35 = vector.broadcast %cst_17 : f32 to vector<8x256xf32>
    %36 = arith.mulf %35, %34 : vector<8x256xf32>
    %37 = arith.mulf %36, %23 : vector<8x256xf32>
    %cst_18 = arith.constant 1.000000e+00 : f32
    %38 = vector.broadcast %cst_18 : f32 to vector<8x256xf32>
    %cst_19 = arith.constant 2.000000e+00 : f32
    %39 = vector.broadcast %cst_19 : f32 to vector<8x256xf32>
    %40 = arith.mulf %39, %32 : vector<8x256xf32>
    %41 = arith.mulf %40, %32 : vector<8x256xf32>
    %42 = arith.subf %41, %38 : vector<8x256xf32>
    %cst_20 = arith.constant 1.000000e+00 : f32
    %43 = vector.broadcast %cst_20 : f32 to vector<8x256xf32>
    %44 = arith.addf %42, %43 : vector<8x256xf32>
    %cst_21 = arith.constant 5.000000e-01 : f32
    %45 = vector.broadcast %cst_21 : f32 to vector<8x256xf32>
    %46 = arith.mulf %45, %44 : vector<8x256xf32>
    %47 = arith.mulf %46, %23 : vector<8x256xf32>
    %cst_22 = arith.constant 2.000000e+00 : f32
    %48 = vector.broadcast %cst_22 : f32 to vector<8x256xf32>
    %49 = arith.mulf %48, %32 : vector<8x256xf32>
    %50 = arith.mulf %49, %42 : vector<8x256xf32>
    %51 = arith.subf %50, %32 : vector<8x256xf32>
    %cst_23 = arith.constant 1.000000e+00 : f32
    %52 = vector.broadcast %cst_23 : f32 to vector<8x256xf32>
    %53 = arith.addf %51, %52 : vector<8x256xf32>
    %cst_24 = arith.constant 5.000000e-01 : f32
    %54 = vector.broadcast %cst_24 : f32 to vector<8x256xf32>
    %55 = arith.mulf %54, %53 : vector<8x256xf32>
    %56 = arith.mulf %55, %23 : vector<8x256xf32>
    %cst_25 = arith.constant 2.000000e+00 : f32
    %57 = vector.broadcast %cst_25 : f32 to vector<8x256xf32>
    %58 = arith.mulf %57, %32 : vector<8x256xf32>
    %59 = arith.mulf %58, %51 : vector<8x256xf32>
    %60 = arith.subf %59, %42 : vector<8x256xf32>
    %cst_26 = arith.constant 1.000000e+00 : f32
    %61 = vector.broadcast %cst_26 : f32 to vector<8x256xf32>
    %62 = arith.addf %60, %61 : vector<8x256xf32>
    %cst_27 = arith.constant 5.000000e-01 : f32
    %63 = vector.broadcast %cst_27 : f32 to vector<8x256xf32>
    %64 = arith.mulf %63, %62 : vector<8x256xf32>
    %65 = arith.mulf %64, %23 : vector<8x256xf32>
    %cst_28 = arith.constant 2.000000e+00 : f32
    %66 = vector.broadcast %cst_28 : f32 to vector<8x256xf32>
    %67 = arith.mulf %66, %32 : vector<8x256xf32>
    %68 = arith.mulf %67, %60 : vector<8x256xf32>
    %69 = arith.subf %68, %51 : vector<8x256xf32>
    %cst_29 = arith.constant 1.000000e+00 : f32
    %70 = vector.broadcast %cst_29 : f32 to vector<8x256xf32>
    %71 = arith.addf %69, %70 : vector<8x256xf32>
    %cst_30 = arith.constant 5.000000e-01 : f32
    %72 = vector.broadcast %cst_30 : f32 to vector<8x256xf32>
    %73 = arith.mulf %72, %71 : vector<8x256xf32>
    %74 = arith.mulf %73, %23 : vector<8x256xf32>
    %75 = tpu.concatenate %23, %37, %47, %56, %65, %74 in 0 : vector<8x256xf32>, vector<8x256xf32>, vector<8x256xf32>, vector<8x256xf32>, vector<8x256xf32>, vector<8x256xf32> -> vector<48x256xf32>
    %c0_31 = arith.constant 0 : index
    %c0_32 = arith.constant 0 : index
    %76 = vector.load %arg2[%c0_31, %c0_32] : memref<8x48xf32, #tpu.memory_space<vmem>>, vector<8x48xf32>
    %cst_33 = arith.constant dense<0.000000e+00> : vector<8x256xf32>
    %77 = tpu.matmul %76, %75, %cst_33 {dimension_numbers = #tpu.dot_dimension_numbers<[1], [0], [0], [1], [0, 0, 1, 1], [], []>} : vector<8x48xf32>, vector<48x256xf32>, vector<8x256xf32> -> vector<8x256xf32>
    %78 = vector.extract_strided_slice %77 {offsets = [0, 0], sizes = [4, 256], strides = [1, 1]} : vector<8x256xf32> to vector<4x256xf32>
    %79 = vector.broadcast %6 : vector<1x256xf32> to vector<4x256xf32>
    %80 = arith.mulf %79, %78 : vector<4x256xf32>
    %81 = vector.extract_strided_slice %77 {offsets = [4, 0], sizes = [4, 256], strides = [1, 1]} : vector<8x256xf32> to vector<4x256xf32>
    %82 = vector.broadcast %4 : vector<1x256xf32> to vector<4x256xf32>
    %83 = arith.mulf %82, %81 : vector<4x256xf32>
    %84 = arith.addf %80, %83 : vector<4x256xf32>
    %85 = math.absf %0 : vector<8x256xf32>
    %cst_34 = arith.constant 9.99999974E-6 : f32
    %86 = vector.broadcast %cst_34 : f32 to vector<8x256xf32>
    %87 = arith.cmpf ogt, %85, %86 : vector<8x256xf32>
    %cst_35 = arith.constant 4.000000e+00 : f32
    %88 = vector.broadcast %cst_35 : f32 to vector<8x256xf32>
    %89 = arith.cmpf ole, %0, %88 : vector<8x256xf32>
    %90 = arith.andi %87, %89 : vector<8x256xi1>
    %cst_36 = arith.constant 3.14159274 : f32
    %91 = vector.broadcast %cst_36 : f32 to vector<8x256xf32>
    %92 = arith.mulf %91, %0 : vector<8x256xf32>
    %cst_37 = arith.constant 2.500000e-01 : f32
    %93 = vector.broadcast %cst_37 : f32 to vector<8x256xf32>
    %94 = arith.mulf %92, %93 : vector<8x256xf32>
    %95 = math.cos %94 : vector<8x256xf32>
    %cst_38 = arith.constant 5.000000e-01 : f32
    %96 = vector.broadcast %cst_38 : f32 to vector<8x256xf32>
    %97 = arith.mulf %96, %95 : vector<8x256xf32>
    %cst_39 = arith.constant 5.000000e-01 : f32
    %98 = vector.broadcast %cst_39 : f32 to vector<8x256xf32>
    %99 = arith.addf %98, %97 : vector<8x256xf32>
    %cst_40 = arith.constant 0.000000e+00 : f32
    %100 = vector.broadcast %cst_40 : f32 to vector<8x256xf32>
    %101 = arith.select %90, %99, %100 : vector<8x256xi1>, vector<8x256xf32>
    %cst_41 = arith.constant 2.500000e-01 : f32
    %102 = vector.broadcast %cst_41 : f32 to vector<8x256xf32>
    %103 = arith.mulf %0, %102 : vector<8x256xf32>
    %cst_42 = arith.constant 1.000000e+00 : f32
    %104 = vector.broadcast %cst_42 : f32 to vector<8x256xf32>
    %105 = arith.subf %103, %104 : vector<8x256xf32>
    %106 = arith.mulf %105, %105 : vector<8x256xf32>
    %cst_43 = arith.constant 2.000000e+00 : f32
    %107 = vector.broadcast %cst_43 : f32 to vector<8x256xf32>
    %108 = arith.mulf %107, %106 : vector<8x256xf32>
    %cst_44 = arith.constant 1.000000e+00 : f32
    %109 = vector.broadcast %cst_44 : f32 to vector<8x256xf32>
    %110 = arith.subf %108, %109 : vector<8x256xf32>
    %cst_45 = arith.constant 2.000000e+00 : f32
    %111 = vector.broadcast %cst_45 : f32 to vector<8x256xf32>
    %112 = arith.mulf %111, %110 : vector<8x256xf32>
    %113 = arith.mulf %112, %110 : vector<8x256xf32>
    %cst_46 = arith.constant 1.000000e+00 : f32
    %114 = vector.broadcast %cst_46 : f32 to vector<8x256xf32>
    %115 = arith.subf %113, %114 : vector<8x256xf32>
    %cst_47 = arith.constant 2.000000e+00 : f32
    %116 = vector.broadcast %cst_47 : f32 to vector<8x256xf32>
    %117 = arith.mulf %116, %110 : vector<8x256xf32>
    %118 = arith.mulf %117, %115 : vector<8x256xf32>
    %119 = arith.subf %118, %110 : vector<8x256xf32>
    %120 = arith.addf %110, %115 : vector<8x256xf32>
    %121 = arith.addf %120, %119 : vector<8x256xf32>
    %cst_48 = arith.constant 5.000000e-01 : f32
    %122 = vector.broadcast %cst_48 : f32 to vector<8x256xf32>
    %123 = arith.mulf %122, %121 : vector<8x256xf32>
    %cst_49 = arith.constant 2.500000e+00 : f32
    %124 = vector.broadcast %cst_49 : f32 to vector<8x256xf32>
    %125 = arith.addf %124, %123 : vector<8x256xf32>
    %126 = arith.mulf %101, %125 : vector<8x256xf32>
    %127 = math.absf %0 : vector<8x256xf32>
    %cst_50 = arith.constant 9.99999974E-6 : f32
    %128 = vector.broadcast %cst_50 : f32 to vector<8x256xf32>
    %129 = arith.cmpf ogt, %127, %128 : vector<8x256xf32>
    %130 = tpu.reciprocal %0 {approx = true} : vector<8x256xf32> -> vector<8x256xf32>
    %131 = arith.mulf %0, %130 : vector<8x256xf32>
    %cst_51 = arith.constant 2.000000e+00 : f32
    %132 = vector.broadcast %cst_51 : f32 to vector<8x256xf32>
    %133 = arith.subf %132, %131 : vector<8x256xf32>
    %134 = arith.mulf %130, %133 : vector<8x256xf32>
    %cst_52 = arith.constant 0.000000e+00 : f32
    %135 = vector.broadcast %cst_52 : f32 to vector<8x256xf32>
    %136 = arith.select %129, %134, %135 : vector<8x256xi1>, vector<8x256xf32>
    %137 = arith.mulf %136, %1 : vector<8x256xf32>
    %138 = arith.mulf %136, %2 : vector<8x256xf32>
    %139 = arith.mulf %136, %3 : vector<8x256xf32>
    %140 = arith.mulf %137, %137 : vector<8x256xf32>
    %141 = arith.mulf %138, %138 : vector<8x256xf32>
    %142 = arith.mulf %139, %139 : vector<8x256xf32>
    %143 = arith.mulf %137, %138 : vector<8x256xf32>
    %144 = arith.addf %137, %138 : vector<8x256xf32>
    %cst_53 = arith.constant 2.000000e+00 : f32
    %145 = vector.broadcast %cst_53 : f32 to vector<8x256xf32>
    %146 = arith.mulf %145, %143 : vector<8x256xf32>
    %147 = arith.subf %140, %141 : vector<8x256xf32>
    %148 = arith.addf %147, %146 : vector<8x256xf32>
    %149 = arith.mulf %139, %144 : vector<8x256xf32>
    %cst_54 = arith.constant 5.000000e+00 : f32
    %150 = vector.broadcast %cst_54 : f32 to vector<8x256xf32>
    %151 = arith.mulf %150, %142 : vector<8x256xf32>
    %cst_55 = arith.constant 7.000000e+00 : f32
    %152 = vector.broadcast %cst_55 : f32 to vector<8x256xf32>
    %153 = arith.mulf %152, %142 : vector<8x256xf32>
    %cst_56 = arith.constant 3.000000e+00 : f32
    %154 = vector.broadcast %cst_56 : f32 to vector<8x256xf32>
    %155 = arith.mulf %154, %141 : vector<8x256xf32>
    %156 = arith.subf %140, %155 : vector<8x256xf32>
    %157 = arith.mulf %156, %137 : vector<8x256xf32>
    %cst_57 = arith.constant 3.000000e+00 : f32
    %158 = vector.broadcast %cst_57 : f32 to vector<8x256xf32>
    %159 = arith.mulf %158, %140 : vector<8x256xf32>
    %160 = arith.subf %159, %141 : vector<8x256xf32>
    %161 = arith.mulf %160, %138 : vector<8x256xf32>
    %162 = arith.addf %157, %161 : vector<8x256xf32>
    %cst_58 = arith.constant 0.238732412 : f32
    %163 = vector.broadcast %cst_58 : f32 to vector<8x256xf32>
    %164 = arith.mulf %163, %139 : vector<8x256xf32>
    %cst_59 = arith.constant 0.119366206 : f32
    %165 = vector.broadcast %cst_59 : f32 to vector<8x256xf32>
    %166 = arith.mulf %165, %144 : vector<8x256xf32>
    %167 = arith.addf %164, %166 : vector<8x256xf32>
    %cst_60 = arith.constant 3.000000e+00 : f32
    %168 = vector.broadcast %cst_60 : f32 to vector<8x256xf32>
    %169 = arith.mulf %168, %142 : vector<8x256xf32>
    %cst_61 = arith.constant 1.000000e+00 : f32
    %170 = vector.broadcast %cst_61 : f32 to vector<8x256xf32>
    %171 = arith.subf %169, %170 : vector<8x256xf32>
    %cst_62 = arith.constant 0.0994718372 : f32
    %172 = vector.broadcast %cst_62 : f32 to vector<8x256xf32>
    %173 = arith.mulf %172, %171 : vector<8x256xf32>
    %cst_63 = arith.constant 5.968310e-01 : f32
    %174 = vector.broadcast %cst_63 : f32 to vector<8x256xf32>
    %175 = arith.mulf %174, %149 : vector<8x256xf32>
    %176 = arith.addf %173, %175 : vector<8x256xf32>
    %cst_64 = arith.constant 0.149207756 : f32
    %177 = vector.broadcast %cst_64 : f32 to vector<8x256xf32>
    %178 = arith.mulf %177, %148 : vector<8x256xf32>
    %179 = arith.addf %176, %178 : vector<8x256xf32>
    %cst_65 = arith.constant 3.000000e+00 : f32
    %180 = vector.broadcast %cst_65 : f32 to vector<8x256xf32>
    %181 = arith.subf %151, %180 : vector<8x256xf32>
    %182 = arith.mulf %181, %139 : vector<8x256xf32>
    %cst_66 = arith.constant 0.139260575 : f32
    %183 = vector.broadcast %cst_66 : f32 to vector<8x256xf32>
    %184 = arith.mulf %183, %182 : vector<8x256xf32>
    %cst_67 = arith.constant 1.000000e+00 : f32
    %185 = vector.broadcast %cst_67 : f32 to vector<8x256xf32>
    %186 = arith.subf %151, %185 : vector<8x256xf32>
    %187 = arith.mulf %186, %144 : vector<8x256xf32>
    %cst_68 = arith.constant 0.104445435 : f32
    %188 = vector.broadcast %cst_68 : f32 to vector<8x256xf32>
    %189 = arith.mulf %188, %187 : vector<8x256xf32>
    %190 = arith.addf %184, %189 : vector<8x256xf32>
    %191 = arith.mulf %139, %148 : vector<8x256xf32>
    %cst_69 = arith.constant 1.04445434 : f32
    %192 = vector.broadcast %cst_69 : f32 to vector<8x256xf32>
    %193 = arith.mulf %192, %191 : vector<8x256xf32>
    %194 = arith.addf %190, %193 : vector<8x256xf32>
    %cst_70 = arith.constant 0.174075723 : f32
    %195 = vector.broadcast %cst_70 : f32 to vector<8x256xf32>
    %196 = arith.mulf %195, %162 : vector<8x256xf32>
    %197 = arith.addf %194, %196 : vector<8x256xf32>
    %cst_71 = arith.constant 3.500000e+01 : f32
    %198 = vector.broadcast %cst_71 : f32 to vector<8x256xf32>
    %199 = arith.mulf %198, %142 : vector<8x256xf32>
    %cst_72 = arith.constant 3.000000e+01 : f32
    %200 = vector.broadcast %cst_72 : f32 to vector<8x256xf32>
    %201 = arith.subf %199, %200 : vector<8x256xf32>
    %202 = arith.mulf %201, %142 : vector<8x256xf32>
    %cst_73 = arith.constant 3.000000e+00 : f32
    %203 = vector.broadcast %cst_73 : f32 to vector<8x256xf32>
    %204 = arith.addf %202, %203 : vector<8x256xf32>
    %cst_74 = arith.constant 0.0111905821 : f32
    %205 = vector.broadcast %cst_74 : f32 to vector<8x256xf32>
    %206 = arith.mulf %205, %204 : vector<8x256xf32>
    %cst_75 = arith.constant 3.000000e+00 : f32
    %207 = vector.broadcast %cst_75 : f32 to vector<8x256xf32>
    %208 = arith.subf %153, %207 : vector<8x256xf32>
    %209 = arith.mulf %208, %149 : vector<8x256xf32>
    %cst_76 = arith.constant 0.223811641 : f32
    %210 = vector.broadcast %cst_76 : f32 to vector<8x256xf32>
    %211 = arith.mulf %210, %209 : vector<8x256xf32>
    %212 = arith.addf %206, %211 : vector<8x256xf32>
    %cst_77 = arith.constant 1.000000e+00 : f32
    %213 = vector.broadcast %cst_77 : f32 to vector<8x256xf32>
    %214 = arith.subf %153, %213 : vector<8x256xf32>
    %215 = arith.mulf %214, %148 : vector<8x256xf32>
    %cst_78 = arith.constant 0.111905821 : f32
    %216 = vector.broadcast %cst_78 : f32 to vector<8x256xf32>
    %217 = arith.mulf %216, %215 : vector<8x256xf32>
    %218 = arith.addf %212, %217 : vector<8x256xf32>
    %219 = arith.mulf %139, %162 : vector<8x256xf32>
    %cst_79 = arith.constant 1.5666815 : f32
    %220 = vector.broadcast %cst_79 : f32 to vector<8x256xf32>
    %221 = arith.mulf %220, %219 : vector<8x256xf32>
    %222 = arith.addf %218, %221 : vector<8x256xf32>
    %223 = arith.mulf %148, %148 : vector<8x256xf32>
    %224 = arith.mulf %146, %146 : vector<8x256xf32>
    %cst_80 = arith.constant 2.000000e+00 : f32
    %225 = vector.broadcast %cst_80 : f32 to vector<8x256xf32>
    %226 = arith.mulf %225, %224 : vector<8x256xf32>
    %227 = arith.subf %223, %226 : vector<8x256xf32>
    %cst_81 = arith.constant 0.195835188 : f32
    %228 = vector.broadcast %cst_81 : f32 to vector<8x256xf32>
    %229 = arith.mulf %228, %227 : vector<8x256xf32>
    %230 = arith.addf %222, %229 : vector<8x256xf32>
    %231 = arith.mulf %126, %167 : vector<8x256xf32>
    %232 = arith.mulf %126, %179 : vector<8x256xf32>
    %233 = arith.mulf %126, %197 : vector<8x256xf32>
    %234 = arith.mulf %126, %230 : vector<8x256xf32>
    %235 = tpu.concatenate %231, %232, %233, %234 in 0 : vector<8x256xf32>, vector<8x256xf32>, vector<8x256xf32>, vector<8x256xf32> -> vector<32x256xf32>
    %c0_82 = arith.constant 0 : index
    %c0_83 = arith.constant 0 : index
    %236 = vector.load %arg3[%c0_82, %c0_83] : memref<64x4xf32, #tpu.memory_space<vmem>>, vector<64x4xf32>
    %cst_84 = arith.constant dense<0.000000e+00> : vector<64x256xf32>
    %237 = tpu.matmul %236, %84, %cst_84 {dimension_numbers = #tpu.dot_dimension_numbers<[1], [0], [0], [1], [0, 0, 1, 1], [], []>} : vector<64x4xf32>, vector<4x256xf32>, vector<64x256xf32> -> vector<64x256xf32>
    %c0_85 = arith.constant 0 : index
    %c0_86 = arith.constant 0 : index
    %238 = vector.load %arg4[%c0_85, %c0_86] : memref<64x32xf32, #tpu.memory_space<vmem>>, vector<64x32xf32>
    %cst_87 = arith.constant dense<0.000000e+00> : vector<64x256xf32>
    %239 = tpu.matmul %238, %235, %cst_87 {dimension_numbers = #tpu.dot_dimension_numbers<[1], [0], [0], [1], [0, 0, 1, 1], [], []>} : vector<64x32xf32>, vector<32x256xf32>, vector<64x256xf32> -> vector<64x256xf32>
    %240 = arith.addf %237, %239 : vector<64x256xf32>
    %c0_88 = arith.constant 0 : index
    %c0_89 = arith.constant 0 : index
    %241 = vector.load %arg5[%c0_88, %c0_89] : memref<64x1xf32, #tpu.memory_space<vmem>>, vector<64x1xf32>
    %242 = vector.broadcast %241 : vector<64x1xf32> to vector<64x256xf32>
    %243 = arith.addf %240, %242 : vector<64x256xf32>
    %244 = math.tanh %243 : vector<64x256xf32>
    %c0_90 = arith.constant 0 : index
    %c0_91 = arith.constant 0 : index
    %245 = vector.load %arg6[%c0_90, %c0_91] : memref<2x64xf32, #tpu.memory_space<vmem>>, vector<2x64xf32>
    %cst_92 = arith.constant dense<0.000000e+00> : vector<2x256xf32>
    %246 = tpu.matmul %245, %244, %cst_92 {dimension_numbers = #tpu.dot_dimension_numbers<[1], [0], [0], [1], [0, 0, 1, 1], [], []>} : vector<2x64xf32>, vector<64x256xf32>, vector<2x256xf32> -> vector<2x256xf32>
    %c0_93 = arith.constant 0 : index
    %c0_94 = arith.constant 0 : index
    %247 = vector.load %arg7[%c0_93, %c0_94] : memref<2x1xf32, #tpu.memory_space<vmem>>, vector<2x1xf32>
    %248 = vector.broadcast %247 : vector<2x1xf32> to vector<2x256xf32>
    %249 = arith.addf %246, %248 : vector<2x256xf32>
    %250 = vector.extract_strided_slice %249 {offsets = [0, 0], sizes = [1, 256], strides = [1, 1]} : vector<2x256xf32> to vector<1x256xf32>
    %251 = arith.mulf %6, %250 : vector<1x256xf32>
    %252 = vector.extract_strided_slice %249 {offsets = [1, 0], sizes = [1, 256], strides = [1, 1]} : vector<2x256xf32> to vector<1x256xf32>
    %253 = arith.mulf %4, %252 : vector<1x256xf32>
    %254 = arith.addf %251, %253 : vector<1x256xf32>
    %c0_95 = arith.constant 0 : index
    %c0_96 = arith.constant 0 : index
    %255 = vector.load %arg8[%c0_95, %c0_96] : memref<1x256xf32, #tpu.memory_space<vmem>>, vector<1x256xf32>
    tpu.vector_store %arg8[%c0_95, %c0_96], %254 {strides = array<i32>} : memref<1x256xf32, #tpu.memory_space<vmem>>, vector<1x256xf32>,
    return
  }
  func.func @transform_0(%arg0: i32) -> (i32, i32) {
    %c0_i32 = arith.constant 0 : i32
    %c0_i32_0 = arith.constant 0 : i32
    return %c0_i32, %arg0 : i32, i32
  }
  func.func @transform_1(%arg0: i32) -> (i32, i32) {
    %c0_i32 = arith.constant 0 : i32
    %c0_i32_0 = arith.constant 0 : i32
    %c0_i32_1 = arith.constant 0 : i32
    return %c0_i32, %c0_i32_0 : i32, i32
  }
  func.func @transform_2(%arg0: i32) -> (i32, i32) {
    %c0_i32 = arith.constant 0 : i32
    %c0_i32_0 = arith.constant 0 : i32
    %c0_i32_1 = arith.constant 0 : i32
    return %c0_i32, %c0_i32_0 : i32, i32
  }
  func.func @transform_3(%arg0: i32) -> (i32, i32) {
    %c0_i32 = arith.constant 0 : i32
    %c0_i32_0 = arith.constant 0 : i32
    %c0_i32_1 = arith.constant 0 : i32
    return %c0_i32, %c0_i32_0 : i32, i32
  }
  func.func @transform_4(%arg0: i32) -> (i32, i32) {
    %c0_i32 = arith.constant 0 : i32
    %c0_i32_0 = arith.constant 0 : i32
    %c0_i32_1 = arith.constant 0 : i32
    return %c0_i32, %c0_i32_0 : i32, i32
  }
  func.func @transform_5(%arg0: i32) -> (i32, i32) {
    %c0_i32 = arith.constant 0 : i32
    %c0_i32_0 = arith.constant 0 : i32
    %c0_i32_1 = arith.constant 0 : i32
    return %c0_i32, %c0_i32_0 : i32, i32
  }
  func.func @transform_6(%arg0: i32) -> (i32, i32) {
    %c0_i32 = arith.constant 0 : i32
    %c0_i32_0 = arith.constant 0 : i32
    %c0_i32_1 = arith.constant 0 : i32
    return %c0_i32, %c0_i32_0 : i32, i32
  }
  func.func @transform_7(%arg0: i32) -> (i32, i32) {
    %c0_i32 = arith.constant 0 : i32
    %c0_i32_0 = arith.constant 0 : i32
    return %c0_i32, %arg0 : i32, i32
  }
}

</mosaic_0001>

<bundles_post_ra>
// kernel: tpu_custom_call.1
= control target key start
LH: loop header
LB: loop body
LE: loop exit
PB: predicated region body
PF: predicated region fallthrough
CT: control target
= control target key end

     0   :  { %v1542_v7 = vmov 0   ;;  %s2369_s0 = inlined_call_operand.vmem [shape: f32[40,256], index: 0, kind: input, shape index: {}]   ;;  %s2370_s1 = inlined_call_operand.vmem [shape: f32[8,48], index: 1, kind: input, shape index: {}]   ;;  %s2371_s2 = inlined_call_operand.vmem [shape: f32[64,4], index: 2, kind: input, shape index: {}]   ;;  %s2372_s3 = inlined_call_operand.vmem [shape: f32[64,32], index: 3, kind: input, shape index: {}]   ;;  %s2373_s4 = inlined_call_operand.vmem [shape: f32[64,1], index: 4, kind: input, shape index: {}]   ;;  %s2374_s5 = inlined_call_operand.vmem [shape: f32[2,64], index: 5, kind: input, shape index: {}]   ;;  %s2375_s6 = inlined_call_operand.vmem [shape: f32[2,1], index: 6, kind: input, shape index: {}]   ;;  %s2376_s7 = inlined_call_operand.hbm [shape: f32[1,256], index: 7, kind: output, shape index: {}]  }
   0x1   :  { %v1593_v0 = vld [vmem:[%s2369_s0] sm:$0xff]  ;;  %v1604_v3 = vld [vmem:[%s2369_s0 + $0x8] sm:$0xff]  ;;  %1476 = vset.pattern.permute.xlu1 %v1542_v7  ;;  %1475 = vset.pattern.permute.xlu0 %v1542_v7 }
   0x2   :  { %v1596_v1 = vmul.f32 3.1415927, %v1593_v0  ;;  %v1609_v6 = vmul.f32 3.1415927, %v1604_v3  ;;  %1477 = vset.pattern.permute.xlu2 %v1542_v7 }
   0x4   :  { %v1599_v2 = vmul.f32 0.16666667, %v1596_v1 }
   0x6   :  { %v50_v4 = vand.u32 2147483647, %v1599_v2  ;;  %v53_v5 = vand.u32 2139095040, %v1599_v2 }
   0x7   :  { %12 = vsyncpa [#allocation3], 0  ;;  %v1617_v10 = vmul.f32 0.16666667, %v1609_v6  ;;  %v1543_v25 = vmov 683565275   ;;  %1478 = vrcp.f32 %v1593_v0 }
   0x8   :  { %v54_v8 = vshrl.u32 %v53_v5, 23  ;;  %v57_v9 = vand.u32 8388607, %v50_v4  ;;  %v1544_v27 = vmov 2475754826   ;;  %s1381_s24 = sshll.u32 %s2376_s7, 4  ;;  %s1382_s24 = int_to_ptr.hbm [resolvable:$true] %s1381_s24 }
   0x9   :  { %v207_v13 = vand.u32 2139095040, %v1617_v10  ;;  %v204_v15 = vand.u32 2147483647, %v1617_v10  ;;  %v1545_v29 = vmov 2131351028  }
   0xa   :  { %v1391_v11 = vadd.s32 4294967169, %v54_v8  ;;  %v58_v12 = vor.u32 8388608, %v57_v9  ;;  %v1546_v31 = vmov 2102212464   ;;  %v1547_v33 = vmov 920167782  }
   0xb   :  { %v208_v16 = vshrl.u32 %v207_v13, 23  ;;  %v211_v22 = vand.u32 8388607, %v204_v15  ;;  %v1548_v42 = vmov 1326507024  }
   0xc   :  { %v60_v14 = vadd.s32 1, %v1391_v11  ;;  %v1621_v18 = vshll.u32 %v58_v12, 8 }
   0xd   :  { %v1394_v19 = vadd.s32 4294967169, %v208_v16  ;;  %v212_v56 = vor.u32 8388608, %v211_v22 }
   0xe   :  { %vm61_vm0 = vcmp.gt.s32.totalorder %v60_v14, 0  ;;  %v99_v35 = vand.u32 65535, %v1621_v18  ;;  %v100_v36 = vshrl.u32 %v1621_v18, 16 }
   0xf   :  { %v62_v17 = vsel %vm61_vm0, %v60_v14, 0  ;;  %v214_v23 = vadd.s32 1, %v1394_v19  ;;  %v1651_v16 = vshll.u32 %v212_v56, 8 }
  0x10   :  { %v63_v20 = vshrl.u32 %v62_v17, 5  ;;  %v64_v21 = vand.u32 31, %v62_v17 }
  0x11   :  { %vm215_vm3 = vcmp.gt.s32.totalorder %v214_v23, 0 }
  0x12   :  { %v65_v24 = vsub.s32 32, %v64_v21  ;;  %v67_v26 = vshll.u32 %v1543_v25, %v64_v21  ;;  %v70_v28 = vshll.u32 %v1544_v27, %v64_v21  ;;  %v73_v30 = vshll.u32 %v1545_v29, %v64_v21 }
  0x13   :  { %v76_v32 = vshll.u32 %v1546_v31, %v64_v21  ;;  %v79_v34 = vshll.u32 %v1547_v33, %v64_v21  ;;  %vm82_vm1 = vcmp.lt.s32.totalorder %v63_v20, 1  ;;  %vm85_vm2 = vcmp.lt.s32.totalorder %v63_v20, 4 }
  0x14   :  { %v68_v37 = vshrl.u32 %v1544_v27, %v65_v24  ;;  %v71_v38 = vshrl.u32 %v1545_v29, %v65_v24  ;;  %v74_v39 = vshrl.u32 %v1546_v31, %v65_v24  ;;  %v66_v40 = vshrl.u32 %v1543_v25, %v65_v24 }
  0x15   :  { %v77_v41 = vshrl.u32 %v1547_v33, %v65_v24  ;;  %v80_v43 = vshrl.u32 %v1548_v42, %v65_v24  ;;  %vm84_vm4 = vcmp.lt.s32.totalorder %v63_v20, 3  ;;  %v216_v49 = vsel %vm215_vm3, %v214_v23, 0 }
  0x16   :  { %v69_v44 = vor.u32 %v68_v37, %v67_v26  ;;  %v72_v45 = vor.u32 %v71_v38, %v70_v28  ;;  %v75_v46 = vor.u32 %v74_v39, %v73_v30  ;;  %vm83_vm5 = vcmp.lt.s32.totalorder %v63_v20, 2 }
  0x17   :  { %v78_v47 = vor.u32 %v77_v41, %v76_v32  ;;  %v81_v48 = vor.u32 %v80_v43, %v79_v34  ;;  %v218_v60 = vand.u32 31, %v216_v49  ;;  %v1643_v63 = vshrl.u32 %v216_v49, 5 }
  0x18   :  { %v87_v50 = vsel %vm85_vm2, %v75_v46, 2102212464  ;;  %v90_v51 = vsel %vm82_vm1, %v69_v44, %v72_v45  ;;  %v94_v52 = vsel %vm82_vm1, %v72_v45, %v75_v46  ;;  %v86_v53 = vsel %vm82_vm1, %v66_v40, %v69_v44 }
  0x19   :  { %v91_v54 = vsel %vm85_vm2, %v78_v47, 920167782  ;;  %v95_v55 = vsel %vm85_vm2, %v81_v48, 1326507024  ;;  %v88_v57 = vsel %vm84_vm4, %v72_v45, %v87_v50  ;;  %v1648_v13 = vsub.s32 32, %v218_v60 }
  0x1a   :  { %v92_v58 = vsel %vm84_vm4, %v75_v46, %v91_v54  ;;  %v96_v59 = vsel %vm84_vm4, %v78_v47, %v95_v55  ;;  %v1646_v12 = vsel %vm83_vm5, %v86_v53, %v88_v57  ;;  %v221_v14 = vshll.u32 %v1543_v25, %v218_v60 }
  0x1b   :  { %v93_v61 = vsel %vm83_vm5, %v90_v51, %v92_v58  ;;  %v97_v62 = vsel %vm83_vm5, %v94_v52, %v96_v59  ;;  %v224_v22 = vshll.u32 %v1544_v27, %v218_v60  ;;  %v227_v28 = vshll.u32 %v1545_v29, %v218_v60 }
  0x1c   :  { %v101_v5 = vand.u32 65535, %v97_v62  ;;  %v102_v8 = vshrl.u32 %v97_v62, 16  ;;  %v123_v9 = vand.u32 65535, %v93_v61  ;;  %v124_v11 = vshrl.u32 %v93_v61, 16 }
  0x1d   :  { %vm236_vm6 = vcmp.lt.s32.totalorder %v1643_v63, 1  ;;  %v222_v44 = vshrl.u32 %v1544_v27, %v1648_v13  ;;  %v225_v46 = vshrl.u32 %v1545_v29, %v1648_v13  ;;  %v228_v55 = vshrl.u32 %v1546_v31, %v1648_v13 }
  0x1e   :  { %v103_v17 = vmul.u32 %v101_v5, %v99_v35  ;;  %v104_v19 = vmul.u32 %v102_v8, %v99_v35  ;;  %v105_v21 = vmul.u32 %v101_v5, %v100_v36  ;;  %v125_v23 = vmul.u32 %v123_v9, %v99_v35 }
  0x1f   :  { %v126_v24 = vmul.u32 %v124_v11, %v99_v35  ;;  %v127_v26 = vmul.u32 %v123_v9, %v100_v36  ;;  %v106_v30 = vmul.u32 %v102_v8, %v100_v36  ;;  %v128_v34 = vmul.u32 %v124_v11, %v100_v36 }
  0x20   :  { %v107_v20 = vshll.u32 %v104_v19, 16  ;;  %v109_v32 = vshll.u32 %v105_v21, 16  ;;  %v108_v37 = vshrl.u32 %v104_v19, 16  ;;  %v110_v38 = vshrl.u32 %v105_v21, 16 }
  0x21   :  { %v129_v39 = vshll.u32 %v126_v24, 16  ;;  %v131_v40 = vshll.u32 %v127_v26, 16  ;;  %v130_v43 = vshrl.u32 %v126_v24, 16  ;;  %v132_v47 = vshrl.u32 %v127_v26, 16 }
  0x22   :  { %vm111_vm7 = vc.u32 %v103_v17, %v107_v20  ;;  %v113_v41 = vadd.s32 %v107_v20, %v103_v17  ;;  %v1663_v51 = vor.u32 %v222_v44, %v221_v14  ;;  %v1666_v54 = vor.u32 %v225_v46, %v224_v22 }
  0x23   :  { %v112_v35 = vsel %vm111_vm7, 1, %v1542_v7  ;;  %vm133_vm8 = vc.u32 %v125_v23, %v129_v39  ;;  %v135_v45 = vadd.s32 %v129_v39, %v125_v23  ;;  %v230_v57 = vshll.u32 %v1546_v31, %v218_v60 }
  0x24   :  { %v114_v36 = vadd.s32 %v112_v35, %v106_v30  ;;  %vm115_vm9 = vc.u32 %v113_v41, %v109_v32  ;;  %v134_v48 = vsel %vm133_vm8, 1, %v1542_v7  ;;  %v231_v58 = vshrl.u32 %v1547_v33, %v1648_v13 }
  0x25   :  { %v116_v49 = vsel %vm115_vm9, 1, %v1542_v7  ;;  %v136_v50 = vadd.s32 %v134_v48, %v128_v34  ;;  %vm137_vm10 = vc.u32 %v135_v45, %v131_v40  ;;  %v233_v59 = vshll.u32 %v1547_v33, %v218_v60 }
  0x26   :  { %v118_v52 = vadd.s32 %v116_v49, %v114_v36  ;;  %v138_v53 = vsel %vm137_vm10, 1, %v1542_v7  ;;  %v1674_v62 = vadd.s32 %v135_v45, %v131_v40  ;;  %v229_v5 = vor.u32 %v228_v55, %v227_v28 }
  0x27   :  { %v140_v56 = vadd.s32 %v138_v53, %v136_v50  ;;  %v234_v8 = vshrl.u32 %v1548_v42, %v1648_v13  ;;  %v232_v11 = vor.u32 %v231_v58, %v230_v57  ;;  %vm238_vm11 = vcmp.lt.s32.totalorder %v1643_v63, 3 }
  0x28   :  { %v119_v61 = vadd.s32 %v118_v52, %v108_v37  ;;  %vm239_vm12 = vcmp.lt.s32.totalorder %v1643_v63, 4  ;;  %vm237_vm13 = vcmp.lt.s32.totalorder %v1643_v63, 2  ;;  %v244_v60 = vsel %vm236_vm6, %v1663_v51, %v1666_v54 }
  0x29   :  { %v141_v9 = vadd.s32 %v140_v56, %v130_v43  ;;  %v235_v17 = vor.u32 %v234_v8, %v233_v59  ;;  %v245_v21 = vsel %vm239_vm12, %v232_v11, 920167782  ;;  %v143_v22 = vmul.u32 %v1621_v18, %v1646_v12 }
  0x2a   :  { %v1680_v14 = vadd.s32 %v119_v61, %v110_v38  ;;  %v246_v23 = vsel %vm238_vm11, %v229_v5, %v245_v21  ;;  %v253_v24 = vand.u32 65535, %v1651_v16  ;;  %v364_v28 = vmul.f32 0.16666667, %v1593_v0 }
  0x2b   :  { %v142_v19 = vadd.s32 %v141_v9, %v132_v47  ;;  %v247_v30 = vsel %vm237_vm13, %v244_v60, %v246_v23  ;;  %v248_v20 = vsel %vm236_vm6, %v1666_v54, %v229_v5  ;;  %v249_v18 = vsel %vm239_vm12, %v235_v17, 1326507024 }
  0x2c   :  { %vm145_vm14 = vc.u32 %v1680_v14, %v1674_v62  ;;  %v278_v12 = vshrl.u32 %v247_v30, 16  ;;  %v250_v34 = vsel %vm238_vm11, %v232_v11, %v249_v18  ;;  %v254_v37 = vshrl.u32 %v1651_v16, 16 }
  0x2d   :  { %v146_v26 = vadd.s32 1, %v142_v19  ;;  %v277_v38 = vand.u32 65535, %v247_v30  ;;  %v1397_v40 = vadd.f32 -1.0, %v364_v28  ;;  %v251_v41 = vsel %vm237_vm13, %v248_v20, %v250_v34 }
  0x2e   :  { %v280_v43 = vmul.u32 %v278_v12, %v253_v24  ;;  %v255_v44 = vand.u32 65535, %v251_v41  ;;  %v256_v35 = vshrl.u32 %v251_v41, 16  ;;  %v220_v58 = vshrl.u32 %v1543_v25, %v1648_v13 }
  0x2f   :  { %v147_v32 = vsel %vm145_vm14, %v146_v26, %v142_v19  ;;  %v279_v47 = vmul.u32 %v277_v38, %v253_v24  ;;  %v368_v49 = vmul.f32 %v1397_v40, %v1397_v40  ;;  %v281_v56 = vmul.u32 %v277_v38, %v254_v37 }
  0x30   :  { %v148_v39 = vadd.s32 %v147_v32, %v143_v22  ;;  %v257_v46 = vmul.u32 %v255_v44, %v253_v24  ;;  %v258_v36 = vmul.u32 %v256_v35, %v253_v24  ;;  %v259_v50 = vmul.u32 %v255_v44, %v254_v37 }
  0x31   :  { %v283_v52 = vshll.u32 %v280_v43, 16  ;;  %v260_v53 = vmul.u32 %v256_v35, %v254_v37  ;;  %v241_v61 = vsel %vm239_vm12, %v229_v5, 2102212464  ;;  %v282_v9 = vmul.u32 %v278_v12, %v254_v37 }
  0x32   :  { %v149_v45 = vadd.s32 536870912, %v148_v39  ;;  %v261_v55 = vshll.u32 %v258_v36, 16  ;;  %v263_v59 = vshll.u32 %v259_v50, 16  ;;  %v370_v17 = vmul.f32 2.0, %v368_v49 }
  0x33   :  { %vm287_vm0 = vc.u32 %v279_v47, %v283_v52  ;;  %v262_v60 = vshrl.u32 %v258_v36, 16  ;;  %v285_v22 = vshll.u32 %v281_v56, 16  ;;  %v289_v5 = vadd.s32 %v283_v52, %v279_v47 }
  0x34   :  { %v1709_v48 = vshrl.u32 %v149_v45, 30  ;;  %vm265_vm15 = vc.u32 %v257_v46, %v261_v55  ;;  %v267_v8 = vadd.s32 %v261_v55, %v257_v46  ;;  %v288_v24 = vsel %vm287_vm0, 1, %v1542_v7 }
  0x35   :  { %v266_v19 = vsel %vm265_vm15, 1, %v1542_v7  ;;  %v290_v28 = vadd.s32 %v288_v24, %v282_v9  ;;  %v1719_v20 = vadd.f32 -1.0, %v370_v17  ;;  %v240_v18 = vsel %vm236_vm6, %v220_v58, %v1663_v51 }
  0x36   :  { %v151_v57 = vshll.u32 %v1709_v48, 30  ;;  %v268_v21 = vadd.s32 %v266_v19, %v260_v53  ;;  %vm269_vm1 = vc.u32 %v267_v8, %v263_v59  ;;  %v242_v12 = vsel %vm238_vm11, %v1666_v54, %v241_v61 }
  0x37   :  { %v270_v13 = vsel %vm269_vm1, 1, %v1542_v7  ;;  %v264_v34 = vshrl.u32 %v259_v50, 16  ;;  %vm291_vm3 = vc.u32 %v289_v5, %v285_v22  ;;  %v284_v38 = vshrl.u32 %v280_v43, 16 }
  0x38   :  { %v152_v11 = vsub.s32 %v148_v39, %v151_v57  ;;  %v272_v26 = vadd.s32 %v270_v13, %v268_v21  ;;  %v292_v39 = vsel %vm291_vm3, 1, %v1542_v7  ;;  %v144_v44 = vadd.s32 %v1674_v62, %v1680_v14 }
  0x39   :  { %v294_v41 = vadd.s32 %v292_v39, %v290_v28  ;;  %v243_v35 = vsel %vm237_vm13, %v240_v18, %v242_v12  ;;  %v286_v51 = vshrl.u32 %v281_v56, 16  ;;  %v1733_v45 = vmul.f32 2.0, %v1719_v20 }
  0x3a   :  { %vm153_vm2 = vcmp.lt.s32.totalorder %v152_v11, 0  ;;  %v154_v23 = vsub.s32 0, %v152_v11  ;;  %v273_v37 = vadd.s32 %v272_v26, %v262_v60  ;;  %v293_v46 = vadd.s32 %v289_v5, %v285_v22 }
  0x3b   :  { %v295_v47 = vadd.s32 %v294_v41, %v284_v38  ;;  %v297_v53 = vmul.u32 %v1651_v16, %v243_v35  ;;  %v382_v63 = vmul.f32 %v1719_v20, %v1733_v45  ;;  %v365_v56 = vmul.f32 0.16666667, %v1604_v3 }
  0x3c   :  { %v155_v30 = vsel %vm153_vm2, %v154_v23, %v152_v11  ;;  %v274_v54 = vadd.s32 %v273_v37, %v264_v34  ;;  %vm52_vm6 = vcmp.lt.s32.totalorder %v1599_v2, 0  ;;  %vm1748_vm7 = vcmp.le.f32.partialorder %v50_v4, 0.7853982 }
  0x3d   :  { %v156_v32 = vclz %v155_v30  ;;  %v296_v52 = vadd.s32 %v295_v47, %v286_v51  ;;  %v1398_v61 = vadd.f32 -1.0, %v365_v56  ;;  %v174_v12 = vsub.s32 4, %v1709_v48 }
  0x3e   :  { %vm299_vm5 = vc.u32 %v274_v54, %v293_v46  ;;  %vm193_vm13 = vweird.f32 %v1599_v2  ;;  %vm42_vm15 = vcmp.le.f32.partialorder %v1593_v0, 6.0  ;;  %vm206_vm0 = vcmp.lt.s32.totalorder %v1617_v10, 0 }
  0x3f   :  { %v1392_v40 = vadd.s32 4294967294, %v156_v32  ;;  %v300_v14 = vadd.s32 1, %v296_v52  ;;  %v369_v60 = vmul.f32 %v1398_v61, %v1398_v61  ;;  %vm1797_vm1 = vcmp.le.f32.partialorder %v204_v15, 0.7853982 }
  0x40   :  { %vm423_vm3 = vcmask 392192  }
  0x41   :  { %vm1393_vm4 = vcmp.lt.s32.totalorder %v1392_v40, 0  ;;  %v301_v59 = vsel %vm299_vm5, %v300_v14, %v296_v52  ;;  %v371_v5 = vmul.f32 2.0, %v369_v60 }
  0x42   :  { %v159_v36 = vsel %vm1393_vm4, 0, %v1392_v40  ;;  %v302_v17 = vadd.s32 %v301_v59, %v297_v53 }
  0x43   :  { %v160_v43 = vsub.s32 32, %v159_v36  ;;  %v161_v49 = vshll.u32 %v152_v11, %v159_v36  ;;  %v164_v50 = vsub.s32 4294967266, %v159_v36  ;;  %v1739_v11 = vadd.f32 -1.0, %v382_v63 }
  0x44   :  { %v303_v16 = vadd.s32 536870912, %v302_v17  ;;  %v1762_v37 = vadd.f32 -1.0, %v371_v5 }
  0x45   :  { %v162_v55 = vshrl.u32 %v144_v44, %v160_v43  ;;  %v165_v62 = vadd.s32 127, %v164_v50  ;;  %v392_v22 = vmul.f32 %v1739_v11, %v1733_v45  ;;  %v175_v44 = vsel %vm52_vm6, %v174_v12, %v1709_v48 }
  0x46   :  { %v1743_v23 = vshrl.u32 %v303_v16, 30  ;;  %v1770_v47 = vmul.f32 2.0, %v1762_v37 }
  0x47   :  { %v163_v57 = vor.u32 %v162_v55, %v161_v49  ;;  %v166_v58 = vshll.u32 %v165_v62, 23  ;;  %v1756_v30 = vsub.f32 %v392_v22, %v1719_v20  ;;  %v177_v49 = vsel %vm1748_vm7, 0, %v175_v44 }
  0x48   :  { %v305_v26 = vshll.u32 %v1743_v23, 30  ;;  %v298_v55 = vadd.s32 %v293_v46, %v274_v54  ;;  %v383_v48 = vmul.f32 %v1762_v37, %v1770_v47  ;;  %v194_v56 = vand.u32 3, %v177_v49 }
  0x49   :  { %v167_v8 = vor.u32 4788187, %v166_v58  ;;  %v170_v9 = vcvt.s32.f32 %v163_v57  ;;  %v402_v40 = vmul.f32 %v1756_v30, %v1733_v45  ;;  %v328_v15 = vsub.s32 4, %v1743_v23 }
  0x4a   :  { %v306_v18 = vsub.s32 %v302_v17, %v305_v26  ;;  %v1778_v54 = vadd.f32 -1.0, %v383_v48  ;;  %vm199_vm10 = vcmp.eq.s32.totalorder %v194_v56, 2  ;;  %v38_v26 = vand.u32 2147483647, %v1593_v0 }
  0x4b   :  { %v168_v19 = vand.u32 2147483647, %v167_v8  ;;  %v404_v53 = vsub.f32 %v402_v40, %v1739_v11  ;;  %vm196_vm11 = vcmp.eq.s32.totalorder %v194_v56, 0  ;;  %vm195_vm12 = vcmp.lt.s32.totalorder %v194_v56, 2 }
  0x4c   :  { %vm307_vm8 = vcmp.lt.s32.totalorder %v306_v18, 0  ;;  %v308_v34 = vsub.s32 0, %v306_v18  ;;  %v393_v12 = vmul.f32 %v1778_v54, %v1770_v47  ;;  %vm1785_vm14 = vcmp.gt.f32.partialorder %v38_v26, 1e-05 }
  0x4d   :  { %v171_v21 = vmul.f32 %v170_v9, %v168_v19  ;;  %v412_v9 = vmul.f32 %v404_v53, %v1733_v45  ;;  %vm1803_vm2 = vmand %vm1785_vm14, %vm42_vm15  ;;  %v374_v48 = vadd.f32 1.0, %v1719_v20  ;;  %v375_v49 = vadd.f32 1.0, %v1762_v37 }
  0x4e   :  { %v309_v41 = vsel %vm307_vm8, %v308_v34, %v306_v18  ;;  %vm43_vm8 = vcmp.le.f32.partialorder %v1604_v3, 6.0 }
  0x4f   :  { %v172_v24 = vxor.u32 2147483648, %v171_v21  ;;  %v310_v35 = vclz %v309_v41 }
  0x51   :  { %v173_v28 = vsel %vm52_vm6, %v172_v24, %v171_v21  ;;  %v1395_v43 = vadd.s32 4294967294, %v310_v35  ;;  %v414_v24 = vsub.f32 %v412_v9, %v1756_v30  ;;  %v1792_v35 = vsub.f32 %v393_v12, %v1762_v37 }
  0x52   :  { %v176_v4 = vsel %vm1748_vm7, %v1599_v2, %v173_v28  ;;  %v396_v2 = vadd.f32 1.0, %v1756_v30  ;;  %v329_v9 = vsel %vm206_vm0, %v328_v15, %v1743_v23 }
  0x53   :  { %v178_v32 = vmul.f32 %v176_v4, %v176_v4  ;;  %vm1396_vm9 = vcmp.lt.s32.totalorder %v1395_v43, 0 }
  0x54   :  { %v313_v14 = vsel %vm1396_vm9, 0, %v1395_v43  ;;  %vm347_vm9 = vweird.f32 %v1617_v10 }
  0x55   :  { %v179_v38 = vmul.f32 -0.001358992, %v178_v32  ;;  %v186_v39 = vmul.f32 -0.00019511016, %v178_v32  ;;  %v314_v57 = vsub.s32 32, %v313_v14  ;;  %v315_v58 = vshll.u32 %v306_v18, %v313_v14 }
  0x56   :  { %v318_v59 = vsub.s32 4294967266, %v313_v14  ;;  %v398_v14 = vmul.f32 0.5, %v396_v2 }
  0x57   :  { %v180_v51 = vadd.f32 0.041655596, %v179_v38  ;;  %v187_v36 = vadd.f32 0.008332121, %v186_v39  ;;  %v316_v17 = vshrl.u32 %v298_v55, %v314_v57  ;;  %v416_v38 = vadd.f32 1.0, %v414_v24 }
  0x58   :  { %v319_v19 = vadd.s32 127, %v318_v59 }
  0x59   :  { %v181_v50 = vmul.f32 %v180_v51, %v178_v32  ;;  %v188_v52 = vmul.f32 %v187_v36, %v178_v32  ;;  %v317_v46 = vor.u32 %v316_v17, %v315_v58 }
  0x5a   :  { %v320_v21 = vshll.u32 %v319_v19, 23 }
  0x5b   :  { %v182_v62 = vadd.f32 -0.4999988, %v181_v50  ;;  %v189_v63 = vadd.f32 -0.16666654, %v188_v52  ;;  %v324_v28 = vcvt.s32.f32 %v317_v46  ;;  %v418_v50 = vmul.f32 0.5, %v416_v38 }
  0x5c   :  { %v321_v5 = vor.u32 4788187, %v320_v21  ;;  %v331_v21 = vsel %vm1797_vm1, 0, %v329_v9 }
  0x5d   :  { %v183_v61 = vmul.f32 %v182_v62, %v178_v32  ;;  %v190_v8 = vmul.f32 %v189_v63, %v178_v32  ;;  %v403_v63 = vmul.f32 %v1792_v35, %v1770_v47 }
  0x5e   :  { %v322_v32 = vand.u32 2147483647, %v321_v5  ;;  %v1827_v5 = vmul.f32 0.25, %v1596_v1 }
  0x5f   :  { %v184_v16 = vadd.f32 1.0, %v183_v61  ;;  %v191_v60 = vadd.f32 1.0, %v190_v8  ;;  %v405_v17 = vsub.f32 %v403_v63, %v1778_v54 }
  0x60   :  { %v325_v41 = vmul.f32 %v324_v28, %v322_v32  ;;  %v498_v12 = vand.u32 2139095040, %v1827_v5 }
  0x61   :  { %v192_v22 = vmul.f32 %v191_v60, %v176_v4  ;;  %v200_v13 = vxor.u32 2147483648, %v184_v16  ;;  %v406_v4 = vadd.f32 1.0, %v404_v53  ;;  %v386_v53 = vadd.f32 1.0, %v1739_v11 }
  0x62   :  { %v326_v43 = vxor.u32 2147483648, %v325_v41  ;;  %v413_v24 = vmul.f32 %v405_v17, %v1770_v47  ;;  %v1835_v47 = vld [vmem:[%s2370_s1] sm:$0xff]  ;;  %v499_v1 = vshrl.u32 %v498_v12, 23 }
  0x63   :  { %v197_v45 = vxor.u32 2147483648, %v192_v22  ;;  %v201_v18 = vsel %vm199_vm10, %v200_v13, %v192_v22  ;;  %v408_v52 = vmul.f32 0.5, %v406_v4  ;;  %v388_v59 = vmul.f32 0.5, %v386_v53 }
  0x64   :  { %v327_v30 = vsel %vm206_vm0, %v326_v43, %v325_v41  ;;  %v415_v38 = vsub.f32 %v413_v24, %v1792_v35  ;;  %v1407_v2 = vadd.s32 4294967169, %v499_v1  ;;  %v407_v43 = vadd.f32 1.0, %v405_v17 }
  0x65   :  { %v198_v34 = vsel %vm196_vm11, %v184_v16, %v197_v45  ;;  %v330_v62 = vsel %vm1797_vm1, %v1617_v10, %v327_v30  ;;  %v376_v16 = vmul.f32 0.5, %v374_v48  ;;  %v348_v45 = vand.u32 3, %v331_v21 }
  0x66   :  { %v202_v40 = vsel %vm195_vm12, %v198_v34, %v201_v18  ;;  %v332_v11 = vmul.f32 %v330_v62, %v330_v62  ;;  %v495_v18 = vand.u32 2147483647, %v1827_v5  ;;  %v397_v53 = vadd.f32 1.0, %v1792_v35 }
  0x67   :  { %v203_v44 = vsel %vm193_vm13, nan, %v202_v40  ;;  %vm349_vm4 = vcmp.lt.s32.totalorder %v348_v45, 2  ;;  %vm353_vm5 = vcmp.eq.s32.totalorder %v348_v45, 2  ;;  %vm350_vm6 = vcmp.eq.s32.totalorder %v348_v45, 0 }
  0x68   :  { %v358_v51 = vmul.f32 0.5, %v203_v44  ;;  %v333_v61 = vmul.f32 -0.001358992, %v332_v11  ;;  %v340_v8 = vmul.f32 -0.00019511016, %v332_v11  ;;  %v505_v30 = vadd.s32 1, %v1407_v2 }
  0x69   :  { %v502_v4 = vand.u32 8388607, %v495_v18  ;;  %v39_v44 = vand.u32 2147483647, %v1604_v3  ;;  %v409_v48 = vmul.f32 0.5, %v407_v43  ;;  %v1879_v45 = vmul.f32 0.25, %v1609_v6 }
  0x6a   :  { %v360_v55 = vadd.f32 0.5, %v358_v51  ;;  %v334_v60 = vadd.f32 0.041655596, %v333_v61  ;;  %v341_v20 = vadd.f32 0.008332121, %v340_v8  ;;  %vm506_vm10 = vcmp.gt.s32.totalorder %v505_v30, 0 }
  0x6b   :  { %vm1847_vm7 = vcmp.gt.f32.partialorder %v39_v44, 1e-05  ;;  %v377_v61 = vmul.f32 0.5, %v375_v49 }
  0x6c   :  { %v362_v56 = vsel %vm1803_vm2, %v360_v55, 0.0  ;;  %v335_v22 = vmul.f32 %v334_v60, %v332_v11  ;;  %v342_v13 = vmul.f32 %v341_v20, %v332_v11  ;;  %vm1864_vm11 = vmand %vm1847_vm7, %vm43_vm8 }
  0x6d   :  { %v420_v57 = vmul.f32 %v418_v50, %v362_v56  ;;  %v410_v58 = vmul.f32 %v408_v52, %v362_v56  ;;  %v400_v19 = vmul.f32 %v398_v14, %v362_v56  ;;  %v390_v46 = vmul.f32 %v388_v59, %v362_v56 }
  0x6e   :  { %v378_v26 = vmul.f32 %v376_v16, %v362_v56  ;;  %v336_v23 = vadd.f32 -0.4999988, %v335_v22  ;;  %v343_v28 = vadd.f32 -0.16666654, %v342_v13  ;;  %v503_v50 = vor.u32 8388608, %v502_v4 }
  0x6f   :  { %437 = vmatpush.msra.mxu0 %v420_v57  ;;  %v417_v52 = vadd.f32 1.0, %v415_v38  ;;  %v387_v14 = vadd.f32 1.0, %v1778_v54  ;;  %v507_v56 = vsel %vm506_vm10, %v505_v30, 0  ;;  %v399_v54 = vmul.f32 0.5, %v397_v53 }
  0x70   :  { %v337_v32 = vmul.f32 %v336_v23, %v332_v11  ;;  %v344_v34 = vmul.f32 %v343_v28, %v332_v11  ;;  %v1853_v35 = vshll.u32 %v503_v50, 8  ;;  %v1856_v8 = vshrl.u32 %v507_v56, 5 }
  0x71   :  { %438 = vmatpush.msra.mxu0 %v410_v58  ;;  %v419_v57 = vmul.f32 0.5, %v417_v52  ;;  %v509_v58 = vand.u32 31, %v507_v56  ;;  %v389_v59 = vmul.f32 0.5, %v387_v14 }
  0x72   :  { %v338_v40 = vadd.f32 1.0, %v337_v32  ;;  %v345_v41 = vadd.f32 1.0, %v344_v34  ;;  %v545_v21 = vshrl.u32 %v1853_v35, 16  ;;  %vm527_vm12 = vcmp.lt.s32.totalorder %v1856_v8, 1 }
  0x73   :  { %439 = vmatpush.msra.mxu0 %v400_v19  ;;  %v510_v17 = vsub.s32 32, %v509_v58  ;;  %v512_v10 = vshll.u32 %v1543_v25, %v509_v58  ;;  %v515_v19 = vshll.u32 %v1544_v27, %v509_v58  ;;  %v518_v60 = vshll.u32 %v1545_v29, %v509_v58 }
  0x74   :  { %v346_v51 = vmul.f32 %v345_v41, %v330_v62  ;;  %v354_v36 = vxor.u32 2147483648, %v338_v40  ;;  %v521_v20 = vshll.u32 %v1546_v31, %v509_v58  ;;  %v524_v3 = vshll.u32 %v1547_v33, %v509_v58 }
  0x75   :  { %440 = vmatpush.msra.mxu0 %v390_v46  ;;  %v544_v46 = vand.u32 65535, %v1853_v35  ;;  %v513_v13 = vshrl.u32 %v1544_v27, %v510_v17  ;;  %v516_v24 = vshrl.u32 %v1545_v29, %v510_v17  ;;  %v522_v23 = vshrl.u32 %v1547_v33, %v510_v17 }
  0x76   :  { %v351_v15 = vxor.u32 2147483648, %v346_v51  ;;  %v355_v63 = vsel %vm353_vm5, %v354_v36, %v346_v51  ;;  %v525_v28 = vshrl.u32 %v1548_v42, %v510_v17  ;;  %v511_v4 = vshrl.u32 %v1543_v25, %v510_v17 }
  0x77   :  { %441 = vmatpush.msra.mxu0 %v378_v26  ;;  %v519_v26 = vshrl.u32 %v1546_v31, %v510_v17  ;;  %v514_v32 = vor.u32 %v513_v13, %v512_v10  ;;  %v517_v34 = vor.u32 %v516_v24, %v515_v19  ;;  %vm528_vm13 = vcmp.lt.s32.totalorder %v1856_v8, 2 }
  0x78   :  { %v352_v62 = vsel %vm350_vm6, %v338_v40, %v351_v15  ;;  %v523_v41 = vor.u32 %v522_v23, %v521_v20  ;;  %v526_v44 = vor.u32 %v525_v28, %v524_v3  ;;  %vm529_vm15 = vcmp.lt.s32.totalorder %v1856_v8, 3 }
  0x79   :  { %1403 = vmatpush.msk.msra.mxu0 %vm1803_vm2, %v360_v55  ;;  %v356_v11 = vsel %vm349_vm4, %v352_v62, %v355_v63  ;;  %v520_v40 = vor.u32 %v519_v26, %v518_v60  ;;  %vm530_vm0 = vcmp.lt.s32.totalorder %v1856_v8, 4  ;;  %v535_v2 = vsel %vm527_vm12, %v514_v32, %v517_v34  ;;  %v996_v55 = vld [vmem:[%s2372_s3 + $0x8] sm:$0xff] }
  0x7a   :  { %1404 = vmatmul.msk.f32.vlgmr.msra.gmra.mxu0 %vm423_vm3, %v1835_v47  ;;  %v357_v37 = vsel %vm347_vm9, nan, %v356_v11  ;;  %v652_v51 = vand.u32 2139095040, %v1879_v45  ;;  %v536_v43 = vsel %vm530_vm0, %v523_v41, 920167782  ;;  %v540_v52 = vsel %vm530_vm0, %v526_v44, 1326507024 }
  0x7b   :  { %v359_v9 = vmul.f32 0.5, %v357_v37  ;;  %v539_v50 = vsel %vm527_vm12, %v517_v34, %v520_v40  ;;  %v532_v53 = vsel %vm530_vm0, %v520_v40, 2102212464  ;;  %v537_v30 = vsel %vm529_vm15, %v520_v40, %v536_v43 }
  0x7c   :  { %v541_v15 = vsel %vm529_vm15, %v523_v41, %v540_v52  ;;  %v653_v63 = vshrl.u32 %v652_v51, 23  ;;  %v538_v49 = vsel %vm528_vm13, %v535_v2, %v537_v30  ;;  %v533_v58 = vsel %vm529_vm15, %v517_v34, %v532_v53 }
  0x7d   :  { %v361_v22 = vadd.f32 0.5, %v359_v9  ;;  %v542_v62 = vsel %vm528_vm13, %v539_v50, %v541_v15  ;;  %v568_v11 = vand.u32 65535, %v538_v49 }
  0x7e   :  { %v547_v56 = vshrl.u32 %v542_v62, 16  ;;  %v1410_v9 = vadd.s32 4294967169, %v653_v63 }
  0x7f   :  { %v363_v12 = vsel %vm1864_vm11, %v361_v22, 0.0  ;;  %v570_v17 = vmul.u32 %v568_v11, %v544_v46  ;;  %v572_v19 = vmul.u32 %v568_v11, %v545_v21 }
  0x80   :  { %v421_v38 = vmul.f32 %v419_v57, %v363_v12  ;;  %v411_v1 = vmul.f32 %v409_v48, %v363_v12  ;;  %v401_v6 = vmul.f32 %v399_v54, %v363_v12  ;;  %v391_v36 = vmul.f32 %v389_v59, %v363_v12 }
  0x81   :  { %v379_v14 = vmul.f32 %v377_v61, %v363_v12  ;;  %v546_v48 = vand.u32 65535, %v542_v62  ;;  %v569_v57 = vshrl.u32 %v538_v49, 16  ;;  %v531_v54 = vsel %vm527_vm12, %v511_v4, %v514_v32 }
  0x82   :  { %457 = vmatpush.msra.mxu1 %v421_v38  ;;  %v549_v59 = vmul.u32 %v547_v56, %v544_v46  ;;  %v551_v60 = vmul.u32 %v547_v56, %v545_v21  ;;  %v1907_v24 = vsel %vm528_vm13, %v531_v54, %v533_v58  ;;  %v576_v23 = vshll.u32 %v572_v19, 16 }
  0x83   :  { %v548_v37 = vmul.u32 %v546_v48, %v544_v46  ;;  %v550_v61 = vmul.u32 %v546_v48, %v545_v21  ;;  %v571_v10 = vmul.u32 %v569_v57, %v544_v46  ;;  %v573_v3 = vmul.u32 %v569_v57, %v545_v21 }
  0x84   :  { %458 = vmatpush.msra.mxu1 %v411_v1  ;;  %v552_v20 = vshll.u32 %v549_v59, 16  ;;  %v649_v12 = vand.u32 2147483647, %v1879_v45  ;;  %v659_v46 = vadd.s32 1, %v1410_v9  ;;  %v553_v32 = vshrl.u32 %v549_v59, 16 }
  0x85   :  { %v554_v13 = vshll.u32 %v550_v61, 16  ;;  %v574_v26 = vshll.u32 %v571_v10, 16  ;;  %v575_v1 = vshrl.u32 %v571_v10, 16  ;;  %v555_v40 = vshrl.u32 %v550_v61, 16 }
  0x86   :  { %459 = vmatpush.msra.mxu1 %v401_v6  ;;  %vm556_vm1 = vc.u32 %v548_v37, %v552_v20  ;;  %v558_v28 = vadd.s32 %v552_v20, %v548_v37  ;;  %v656_v16 = vand.u32 8388607, %v649_v12  ;;  %v577_v44 = vshrl.u32 %v572_v19, 16 }
  0x87   :  { %v557_v34 = vsel %vm556_vm1, 1, %v1542_v7  ;;  %vm578_vm2 = vc.u32 %v570_v17, %v574_v26  ;;  %v580_v8 = vadd.s32 %v574_v26, %v570_v17  ;;  %v588_v53 = vmul.u32 %v1853_v35, %v1907_v24 }
  0x88   :  { %460 = vmatpush.msra.mxu1 %v391_v36  ;;  %v559_v38 = vadd.s32 %v557_v34, %v551_v60  ;;  %vm560_vm4 = vc.u32 %v558_v28, %v554_v13  ;;  %v579_v21 = vsel %vm578_vm2, 1, %v1542_v7  ;;  %v657_v43 = vor.u32 8388608, %v656_v16 }
  0x89   :  { %v581_v4 = vadd.s32 %v579_v21, %v573_v3  ;;  %vm582_vm5 = vc.u32 %v580_v8, %v576_v23  ;;  %v1920_v36 = vadd.s32 %v580_v8, %v576_v23 }
  0x8a   :  { %461 = vmatpush.msra.mxu1 %v379_v14  ;;  %v1942_v57 = vshll.u32 %v657_v43, 8 }
  0x8c   :  { %1405 = vmatpush.msk.msra.mxu1 %vm1864_vm11, %v361_v22  ;;  %v561_v22 = vsel %vm560_vm4, 1, %v1542_v7  ;;  %v698_v28 = vand.u32 65535, %v1942_v57  ;;  %vm497_vm4 = vcmp.lt.s32.totalorder %v1827_v5, 0 }
  0x8d   :  { %1406 = vmatmul.msk.f32.vlgmr.msra.gmra.mxu1 %vm423_vm3, %v1835_v47  ;;  %v563_v41 = vadd.s32 %v561_v22, %v559_v38  ;;  %v583_v47 = vsel %vm582_vm5, 1, %v1542_v7  ;;  %vm660_vm3 = vcmp.gt.s32.totalorder %v659_v46, 0  ;;  %vm2040_vm5 = vcmp.le.f32.partialorder %v495_v18, 0.7853982 }
  0x8e   :  { %v585_v6 = vadd.s32 %v583_v47, %v581_v4  ;;  %v661_v2 = vsel %vm660_vm3, %v659_v46, 0  ;;  %v699_v46 = vshrl.u32 %v1942_v57, 16 }
  0x8f   :  { %v564_v51 = vadd.s32 %v563_v41, %v553_v32  ;;  %v663_v50 = vand.u32 31, %v661_v2  ;;  %v1925_v30 = vshrl.u32 %v661_v2, 5  ;;  %v1991_v41 = vld [vmem:[%s2369_s0] sm:$0xff] }
  0x90   :  { %v586_v52 = vadd.s32 %v585_v6, %v575_v1 }
  0x91   :  { %v1927_v15 = vadd.s32 %v564_v51, %v555_v40  ;;  %v1929_v63 = vsub.s32 32, %v663_v50  ;;  %v666_v14 = vshll.u32 %v1543_v25, %v663_v50  ;;  %v669_v49 = vshll.u32 %v1544_v27, %v663_v50 }
  0x92   :  { %v587_v62 = vadd.s32 %v586_v52, %v577_v44  ;;  %v672_v48 = vshll.u32 %v1545_v29, %v663_v50  ;;  %v675_v56 = vshll.u32 %v1546_v31, %v663_v50  ;;  %v678_v0 = vshll.u32 %v1547_v33, %v663_v50 }
  0x93   :  { %vm590_vm6 = vc.u32 %v1927_v15, %v1920_v36  ;;  %v667_v35 = vshrl.u32 %v1544_v27, %v1929_v63  ;;  %v670_v11 = vshrl.u32 %v1545_v29, %v1929_v63  ;;  %v673_v58 = vshrl.u32 %v1546_v31, %v1929_v63  ;;  %v1479_v27 = vpop.eup %1478 }
  0x94   :  { %v591_v54 = vadd.s32 1, %v587_v62  ;;  %v676_v37 = vshrl.u32 %v1547_v33, %v1929_v63  ;;  %v679_v59 = vshrl.u32 %v1548_v42, %v1929_v63  ;;  %vm681_vm8 = vcmp.lt.s32.totalorder %v1925_v30, 1 }
  0x95   :  { %v1950_v61 = vor.u32 %v667_v35, %v666_v14  ;;  %v1952_v9 = vor.u32 %v670_v11, %v669_v49  ;;  %vm682_vm9 = vcmp.lt.s32.totalorder %v1925_v30, 2  ;;  %v1956_v17 = vor.u32 %v673_v58, %v672_v48 }
  0x96   :  { %v592_v29 = vsel %vm590_vm6, %v591_v54, %v587_v62  ;;  %v677_v10 = vor.u32 %v676_v37, %v675_v56  ;;  %v680_v31 = vor.u32 %v679_v59, %v678_v0  ;;  %vm683_vm10 = vcmp.lt.s32.totalorder %v1925_v30, 3 }
  0x97   :  { %v593_v19 = vadd.s32 %v592_v29, %v588_v53  ;;  %vm684_vm11 = vcmp.lt.s32.totalorder %v1925_v30, 4  ;;  %v689_v33 = vsel %vm681_vm8, %v1950_v61, %v1952_v9  ;;  %v693_v60 = vsel %vm681_vm8, %v1952_v9, %v1956_v17 }
  0x98   :  { %v690_v42 = vsel %vm684_vm11, %v677_v10, 920167782  ;;  %v694_v20 = vsel %vm684_vm11, %v680_v31, 1326507024  ;;  %v841_v47 = vmul.f32 %v1991_v41, %v1479_v27  ;;  %v589_v31 = vadd.s32 %v1920_v36, %v1927_v15  ;;  %v33_v36 = vld [vmem:[%s2369_s0 + $0x30] sm:$0xff] }
  0x99   :  { %v594_v13 = vadd.s32 536870912, %v593_v19  ;;  %v691_v24 = vsel %vm683_vm10, %v1956_v17, %v690_v42  ;;  %v695_v3 = vsel %vm683_vm10, %v677_v10, %v694_v20 }
  0x9a   :  { %v692_v26 = vsel %vm682_vm9, %v689_v33, %v691_v24  ;;  %v696_v23 = vsel %vm682_vm9, %v693_v60, %v695_v3  ;;  %v843_v56 = vsub.f32 2.0, %v841_v47 }
  0x9b   :  { %v1983_v32 = vshrl.u32 %v594_v13, 30  ;;  %v700_v34 = vand.u32 65535, %v696_v23  ;;  %v701_v8 = vshrl.u32 %v696_v23, 16  ;;  %v722_v21 = vand.u32 65535, %v692_v26  ;;  %v29_v23 = vld [vmem:[%s2369_s0 + $0x10] sm:$0xff] }
  0x9c   :  { %v723_v16 = vshrl.u32 %v692_v26, 16  ;;  %v845_v10 = vmul.f32 %v1479_v27, %v843_v56  ;;  %v31_v27 = vld [vmem:[%s2369_s0 + $0x20] sm:$0xff] }
  0x9d   :  { %v596_v38 = vshll.u32 %v1983_v32, 30  ;;  %v702_v22 = vmul.u32 %v700_v34, %v698_v28  ;;  %v703_v1 = vmul.u32 %v701_v8, %v698_v28  ;;  %v1986_v4 = vmul.u32 %v700_v34, %v699_v46 }
  0x9e   :  { %v705_v44 = vmul.u32 %v701_v8, %v699_v46  ;;  %v724_v43 = vmul.u32 %v722_v21, %v698_v28  ;;  %v725_v50 = vmul.u32 %v723_v16, %v698_v28  ;;  %v726_v53 = vmul.u32 %v722_v21, %v699_v46 }
  0x9f   :  { %v597_v40 = vsub.s32 %v593_v19, %v596_v38  ;;  %v706_v6 = vshll.u32 %v703_v1, 16  ;;  %v708_v2 = vshll.u32 %v1986_v4, 16  ;;  %v727_v62 = vmul.u32 %v723_v16, %v699_v46 }
  0xa0   :  { %v728_v48 = vshll.u32 %v725_v50, 16  ;;  %v730_v35 = vshll.u32 %v726_v53, 16  ;;  %v707_v33 = vshrl.u32 %v703_v1, 16  ;;  %v729_v3 = vshrl.u32 %v725_v50, 16 }
  0xa1   :  { %vm598_vm12 = vcmp.lt.s32.totalorder %v597_v40, 0  ;;  %v599_v51 = vsub.s32 0, %v597_v40  ;;  %vm710_vm13 = vc.u32 %v702_v22, %v706_v6  ;;  %v712_v52 = vadd.s32 %v706_v6, %v702_v22 }
  0xa2   :  { %v711_v49 = vsel %vm710_vm13, 1, %v1542_v7  ;;  %vm732_vm0 = vc.u32 %v724_v43, %v728_v48  ;;  %v734_v54 = vadd.s32 %v728_v48, %v724_v43  ;;  %v665_v46 = vshrl.u32 %v1543_v25, %v1929_v63 }
  0xa3   :  { %v600_v14 = vsel %vm598_vm12, %v599_v51, %v597_v40  ;;  %vm714_vm15 = vc.u32 %v712_v52, %v708_v2  ;;  %v713_v11 = vadd.s32 %v711_v49, %v705_v44  ;;  %v733_v59 = vsel %vm732_vm0, 1, %v1542_v7 }
  0xa4   :  { %v601_v0 = vclz %v600_v14  ;;  %v715_v37 = vsel %vm714_vm15, 1, %v1542_v7  ;;  %v735_v29 = vadd.s32 %v733_v59, %v727_v62  ;;  %vm736_vm1 = vc.u32 %v734_v54, %v730_v35 }
  0xa5   :  { %v717_v42 = vadd.s32 %v715_v37, %v713_v11  ;;  %v737_v60 = vsel %vm736_vm1, 1, %v1542_v7  ;;  %v847_v7 = vsel %vm1785_vm14, %v845_v10, 0.0  ;;  %v686_v34 = vsel %vm684_vm11, %v1956_v17, 2102212464  ;;  %v2030_v17 = vld [vmem:[%s2369_s0 + $0x8] sm:$0xff] }
  0xa6   :  { %v1408_v58 = vadd.s32 4294967294, %v601_v0  ;;  %v739_v26 = vadd.s32 %v737_v60, %v735_v29  ;;  %v709_v8 = vshrl.u32 %v1986_v4, 16  ;;  %v731_v22 = vshrl.u32 %v726_v53, 16 }
  0xa7   :  { %v718_v38 = vadd.s32 %v717_v42, %v707_v33  ;;  %v851_v47 = vmul.f32 %v847_v7, %v31_v27  ;;  %v2018_v44 = vmul.f32 %v847_v7, %v33_v36  ;;  %v619_v6 = vsub.s32 4, %v1983_v32 }
  0xa8   :  { %vm1409_vm2 = vcmp.lt.s32.totalorder %v1408_v58, 0  ;;  %v740_v1 = vadd.s32 %v739_v26, %v729_v3  ;;  %v685_v25 = vsel %vm681_vm8, %v665_v46, %v1950_v61  ;;  %v687_v63 = vsel %vm683_vm10, %v1952_v9, %v686_v34 }
  0xa9   :  { %v604_v19 = vsel %vm1409_vm2, 0, %v1408_v58  ;;  %1480 = vrcp.f32 %v2030_v17  ;;  %v2033_v4 = vadd.s32 %v718_v38, %v709_v8  ;;  %v2035_v43 = vadd.s32 %v734_v54, %v730_v35 }
  0xaa   :  { %v605_v20 = vsub.s32 32, %v604_v19  ;;  %v606_v13 = vshll.u32 %v597_v40, %v604_v19  ;;  %v609_v24 = vsub.s32 4294967266, %v604_v19  ;;  %v849_v40 = vmul.f32 %v847_v7, %v29_v23 }
  0xab   :  { %v741_v52 = vadd.s32 %v740_v1, %v731_v22  ;;  %v620_v9 = vsel %vm497_vm4, %v619_v6, %v1983_v32  ;;  %v809_v53 = vmul.f32 0.25, %v1991_v41  ;;  %v688_v14 = vsel %vm682_vm9, %v685_v25, %v687_v63 }
  0xac   :  { %v607_v15 = vshrl.u32 %v589_v31, %v605_v20  ;;  %v610_v28 = vadd.s32 127, %v609_v24  ;;  %v855_v62 = vmul.f32 %v849_v40, %v849_v40  ;;  %v857_v48 = vmul.f32 %v851_v47, %v851_v47 }
  0xad   :  { %v2052_v56 = vmul.f32 %v2018_v44, %v2018_v44  ;;  %v1413_v18 = vadd.f32 -1.0, %v809_v53  ;;  %v861_v0 = vmul.f32 %v851_v47, %v849_v40  ;;  %v2054_v35 = vadd.f32 %v851_v47, %v849_v40 }
  0xae   :  { %v608_v21 = vor.u32 %v607_v15, %v606_v13  ;;  %v611_v16 = vshll.u32 %v610_v28, 23  ;;  %vm744_vm3 = vc.u32 %v2033_v4, %v2035_v43  ;;  %v877_v54 = vmul.f32 3.0, %v857_v48 }
  0xaf   :  { %v875_v11 = vmul.f32 7.0, %v2052_v56  ;;  %v745_v30 = vadd.s32 1, %v741_v52  ;;  %v1481_v58 = vpop.eup %1480  ;;  %v813_v37 = vmul.f32 %v1413_v18, %v1413_v18  ;;  %v865_v59 = vmul.f32 2.0, %v861_v0 }
  0xb0   :  { %v612_v2 = vor.u32 4788187, %v611_v16  ;;  %v615_v51 = vcvt.s32.f32 %v608_v21  ;;  %v867_v29 = vsub.f32 %v855_v62, %v857_v48  ;;  %v883_v10 = vmul.f32 3.0, %v855_v62 }
  0xb1   :  { %v2063_v19 = vmul.f32 %v2054_v35, %v2018_v44  ;;  %v879_v33 = vsub.f32 %v855_v62, %v877_v54  ;;  %v935_v42 = vmul.f32 35.0, %v2052_v56  ;;  %v815_v20 = vmul.f32 2.0, %v813_v37 }
  0xb2   :  { %v613_v50 = vand.u32 2147483647, %v612_v2  ;;  %v885_v13 = vsub.f32 %v883_v10, %v857_v48  ;;  %v1427_v24 = vadd.f32 -3.0, %v875_v11  ;;  %v842_v3 = vmul.f32 %v2030_v17, %v1481_v58 }
  0xb3   :  { %v622_v26 = vsel %vm2040_vm5, 0, %v620_v9  ;;  %v1425_v27 = vadd.f32 -30.0, %v935_v42  ;;  %v1415_v36 = vadd.f32 -1.0, %v815_v20  ;;  %v2072_v7 = vadd.f32 %v867_v29, %v865_v59 }
  0xb4   :  { %v616_v49 = vmul.f32 %v615_v51, %v613_v50  ;;  %v1429_v15 = vadd.f32 -1.0, %v875_v11  ;;  %v742_v28 = vmul.u32 %v1942_v57, %v688_v14  ;;  %v746_v38 = vsel %vm744_vm3, %v745_v30, %v741_v52 }
  0xb5   :  { %v939_v8 = vmul.f32 %v1425_v27, %v2052_v56  ;;  %v819_v21 = vmul.f32 2.0, %v1415_v36  ;;  %v881_v16 = vmul.f32 %v879_v33, %v849_v40  ;;  %v887_v22 = vmul.f32 %v885_v13, %v851_v47 }
  0xb6   :  { %v617_v32 = vxor.u32 2147483648, %v616_v49  ;;  %v947_v1 = vmul.f32 %v1427_v24, %v2063_v19  ;;  %v844_v6 = vsub.f32 2.0, %v842_v3  ;;  %v955_v57 = vmul.f32 %v1429_v15, %v2072_v7 }
  0xb7   :  { %v941_v25 = vadd.f32 3.0, %v939_v8  ;;  %v821_v63 = vmul.f32 %v1415_v36, %v819_v21  ;;  %v747_v50 = vadd.s32 %v746_v38, %v742_v28  ;;  %v639_v53 = vand.u32 3, %v622_v26  ;;  %v34_v8 = vld [vmem:[%s2369_s0 + $0x38] sm:$0xff] }
  0xb8   :  { %v618_v31 = vsel %vm497_vm4, %v617_v32, %v616_v49  ;;  %v2081_v49 = vadd.f32 %v887_v22, %v881_v16  ;;  %v949_v52 = vmul.f32 0.22381164, %v947_v1  ;;  %v969_v62 = vmul.f32 %v865_v59, %v865_v59 }
  0xb9   :  { %v621_v60 = vsel %vm2040_vm5, %v1827_v5, %v618_v31  ;;  %v1417_v14 = vadd.f32 -1.0, %v821_v63  ;;  %v846_v40 = vmul.f32 %v1481_v58, %v844_v6  ;;  %v943_v18 = vmul.f32 0.011190582, %v941_v25  ;;  %v32_v6 = vld [vmem:[%s2369_s0 + $0x28] sm:$0xff] }
  0xba   :  { %v623_v23 = vmul.f32 %v621_v60, %v621_v60  ;;  %v957_v32 = vmul.f32 0.11190582, %v955_v57  ;;  %v967_v11 = vmul.f32 %v2072_v7, %v2072_v7  ;;  %v748_v54 = vadd.s32 536870912, %v747_v50 }
  0xbb   :  { %v825_v0 = vmul.f32 %v1417_v14, %v819_v21  ;;  %v829_v29 = vadd.f32 %v1417_v14, %v1415_v36  ;;  %v810_v10 = vmul.f32 0.25, %v2030_v17  ;;  %v961_v33 = vmul.f32 %v2081_v49, %v2018_v44 }
  0xbc   :  { %v624_v46 = vmul.f32 -0.001358992, %v623_v23  ;;  %v631_v34 = vmul.f32 -0.00019511016, %v623_v23  ;;  %v971_v59 = vmul.f32 2.0, %v969_v62  ;;  %v2088_v58 = vshrl.u32 %v748_v54, 30 }
  0xbd   :  { %v827_v31 = vsub.f32 %v825_v0, %v1415_v36  ;;  %v951_v13 = vadd.f32 %v949_v52, %v943_v18  ;;  %v1414_v24 = vadd.f32 -1.0, %v810_v10  ;;  %v848_v3 = vsel %vm1847_vm7, %v846_v40, 0.0 }
  0xbe   :  { %v625_v2 = vadd.f32 0.041655596, %v624_v46  ;;  %v632_v51 = vadd.f32 0.008332121, %v631_v34  ;;  %vm640_vm6 = vcmp.lt.s32.totalorder %v639_v53, 2  ;;  %vm644_vm8 = vcmp.eq.s32.totalorder %v639_v53, 2 }
  0xbf   :  { %v750_v26 = vshll.u32 %v2088_v58, 30  ;;  %v831_v36 = vadd.f32 %v829_v29, %v827_v31  ;;  %v814_v15 = vmul.f32 %v1414_v24, %v1414_v24  ;;  %vm641_vm9 = vcmp.eq.s32.totalorder %v639_v53, 0 }
  0xc0   :  { %v626_v61 = vmul.f32 %v625_v2, %v623_v23  ;;  %v633_v9 = vmul.f32 %v632_v51, %v623_v23  ;;  %v963_v28 = vmul.f32 1.5666815, %v961_v33  ;;  %v973_v46 = vsub.f32 %v967_v11, %v971_v59 }
  0xc1   :  { %v751_v34 = vsub.s32 %v747_v50, %v750_v26  ;;  %v959_v16 = vadd.f32 %v957_v32, %v951_v13  ;;  %v816_v22 = vmul.f32 2.0, %v814_v15  ;;  %vm638_vm10 = vweird.f32 %v1827_v5 }
  0xc2   :  { %v627_v47 = vadd.f32 -0.4999988, %v626_v61  ;;  %v634_v48 = vadd.f32 -0.16666654, %v633_v9  ;;  %vm489_vm12 = vcmp.le.f32.partialorder %v1991_v41, 4.0  ;;  %v833_v51 = vmul.f32 0.5, %v831_v36 }
  0xc3   :  { %vm752_vm11 = vcmp.lt.s32.totalorder %v751_v34, 0  ;;  %v753_v1 = vsub.s32 0, %v751_v34  ;;  %v2104_v25 = vmul.f32 %v848_v3, %v34_v8  ;;  %v975_v57 = vmul.f32 0.19583519, %v973_v46  ;;  %vm491_vm13 = vmand %vm1785_vm14, %vm489_vm12 }
  0xc4   :  { %v628_v30 = vmul.f32 %v627_v47, %v623_v23  ;;  %v635_v37 = vmul.f32 %v634_v48, %v623_v23  ;;  %v965_v61 = vadd.f32 %v963_v28, %v959_v16  ;;  %v2107_v14 = vadd.f32 -1.0, %v816_v22 }
  0xc5   :  { %v754_v5 = vsel %vm752_vm11, %v753_v1, %v751_v34  ;;  %v852_v62 = vmul.f32 %v848_v3, %v32_v6  ;;  %v835_v41 = vadd.f32 2.5, %v833_v51  ;;  %v743_v53 = vadd.s32 %v2035_v43, %v2033_v4 }
  0xc6   :  { %v629_v42 = vadd.f32 1.0, %v628_v30  ;;  %v636_v20 = vadd.f32 1.0, %v635_v37  ;;  %v755_v9 = vclz %v754_v5  ;;  %v2115_v18 = vmul.f32 %v2104_v25, %v2104_v25 }
  0xc7   :  { %v977_v0 = vadd.f32 %v975_v57, %v965_v61  ;;  %v773_v32 = vsub.s32 4, %v2088_v58  ;;  %v820_v11 = vmul.f32 2.0, %v2107_v14  ;;  %v858_v37 = vmul.f32 %v852_v62, %v852_v62 }
  0xc8   :  { %v637_v23 = vmul.f32 %v636_v20, %v621_v60  ;;  %v645_v27 = vxor.u32 2147483648, %v629_v42  ;;  %v30_v60 = vld [vmem:[%s2369_s0 + $0x18] sm:$0xff]  ;;  %v1411_v47 = vadd.s32 4294967294, %v755_v9  ;;  %v936_v4 = vmul.f32 35.0, %v2115_v18 }
  0xc9   :  { %v850_v52 = vmul.f32 %v848_v3, %v30_v60  ;;  %vm651_vm14 = vcmp.lt.s32.totalorder %v1879_v45, 0  ;;  %v822_v13 = vmul.f32 %v2107_v14, %v820_v11  ;;  %v876_v3 = vmul.f32 7.0, %v2115_v18 }
  0xca   :  { %v642_v38 = vxor.u32 2147483648, %v637_v23  ;;  %v646_v21 = vsel %vm644_vm8, %v645_v27, %v637_v23  ;;  %vm1412_vm15 = vcmp.lt.s32.totalorder %v1411_v47, 0  ;;  %v774_v20 = vsel %vm651_vm14, %v773_v32, %v2088_v58 }
  0xcb   :  { %v758_v30 = vsel %vm1412_vm15, 0, %v1411_v47  ;;  %v856_v39 = vmul.f32 %v850_v52, %v850_v52  ;;  %v2128_v24 = vadd.f32 %v852_v62, %v850_v52  ;;  %v878_v27 = vmul.f32 3.0, %v858_v37 }
  0xcc   :  { %v643_v2 = vsel %vm641_vm9, %v629_v42, %v642_v38  ;;  %v759_v10 = vsub.s32 32, %v758_v30  ;;  %v760_v31 = vshll.u32 %v751_v34, %v758_v30  ;;  %v763_v33 = vsub.s32 4294967266, %v758_v30 }
  0xcd   :  { %v647_v63 = vsel %vm640_vm6, %v643_v2, %v646_v21  ;;  %v884_v36 = vmul.f32 3.0, %v856_v39  ;;  %v1426_v15 = vadd.f32 -30.0, %v936_v4  ;;  %vm2133_vm0 = vcmp.le.f32.partialorder %v649_v12, 0.7853982 }
  0xce   :  { %v648_v50 = vsel %vm638_vm10, nan, %v647_v63  ;;  %v761_v59 = vshrl.u32 %v743_v53, %v759_v10  ;;  %v764_v42 = vadd.s32 127, %v763_v33  ;;  %v862_v34 = vmul.f32 %v852_v62, %v850_v52 }
  0xcf   :  { %v803_v40 = vmul.f32 0.5, %v648_v50  ;;  %v776_v8 = vsel %vm2133_vm0, 0, %v774_v20  ;;  %v1418_v38 = vadd.f32 -1.0, %v822_v13  ;;  %v2141_v21 = vmul.f32 %v2128_v24, %v2104_v25 }
  0xd0   :  { %v762_v26 = vor.u32 %v761_v59, %v760_v31  ;;  %v765_v23 = vshll.u32 %v764_v42, 23  ;;  %v880_v22 = vsub.f32 %v856_v39, %v878_v27  ;;  %v886_v1 = vsub.f32 %v884_v36, %v858_v37 }
  0xd1   :  { %v805_v48 = vadd.f32 0.5, %v803_v40  ;;  %v1428_v60 = vadd.f32 -3.0, %v876_v3  ;;  %v940_v12 = vmul.f32 %v1426_v15, %v2115_v18  ;;  %v873_v6 = vmul.f32 5.0, %v2052_v56 }
  0xd2   :  { %v766_v46 = vor.u32 4788187, %v765_v23  ;;  %v769_v58 = vcvt.s32.f32 %v762_v26  ;;  %v2145_v51 = vand.u32 3, %v776_v8  ;;  %v866_v63 = vmul.f32 2.0, %v862_v34 }
  0xd3   :  { %v807_v54 = vsel %vm491_vm13, %v805_v48, 0.0  ;;  %v868_v57 = vsub.f32 %v856_v39, %v858_v37  ;;  %v826_v5 = vmul.f32 %v1418_v38, %v820_v11  ;;  %v1421_v50 = vadd.f32 -3.0, %v873_v6 }
  0xd4   :  { %v2119_v29 = vmul.f32 %v835_v41, %v807_v54  ;;  %v767_v16 = vand.u32 2147483647, %v766_v46  ;;  %v1423_v61 = vadd.f32 -1.0, %v873_v6  ;;  %v925_v9 = vmul.f32 %v2072_v7, %v2018_v44 }
  0xd5   :  { %v882_v41 = vmul.f32 %v880_v22, %v850_v52  ;;  %v888_v47 = vmul.f32 %v886_v1, %v852_v62  ;;  %v948_v48 = vmul.f32 %v1428_v60, %v2141_v21  ;;  %v830_v53 = vadd.f32 %v1418_v38, %v2107_v14 }
  0xd6   :  { %v985_v43 = vmul.f32 %v977_v0, %v2119_v29  ;;  %v770_v2 = vmul.f32 %v769_v58, %v767_v16  ;;  %v942_v0 = vadd.f32 3.0, %v940_v12  ;;  %v913_v32 = vmul.f32 %v1421_v50, %v2018_v44 }
  0xd7   :  { %v919_v54 = vmul.f32 %v1423_v61, %v2054_v35  ;;  %v2155_v30 = vadd.f32 %v868_v57, %v866_v63  ;;  %v1430_v39 = vadd.f32 -1.0, %v876_v3  ;;  %v874_v37 = vmul.f32 5.0, %v2115_v18 }
  0xd8   :  { %1040 = vmatpush.msra.mxu2 %v985_v43  ;;  %v771_v40 = vxor.u32 2147483648, %v770_v2  ;;  %v915_v62 = vmul.f32 0.13926058, %v913_v32  ;;  %v927_v31 = vmul.f32 1.0444543, %v925_v9  ;;  %v828_v4 = vsub.f32 %v826_v5, %v2107_v14 }
  0xd9   :  { %v921_v10 = vmul.f32 0.104445435, %v919_v54  ;;  %v2166_v43 = vadd.f32 %v888_v47, %v882_v41  ;;  %v950_v59 = vmul.f32 0.22381164, %v948_v48  ;;  %v944_v42 = vmul.f32 0.011190582, %v942_v0 }
  0xda   :  { %v772_v11 = vsel %vm651_vm14, %v771_v40, %v770_v2  ;;  %v931_v13 = vmul.f32 0.17407572, %v2081_v49  ;;  %v897_v3 = vmul.f32 3.0, %v2052_v56  ;;  %v956_v27 = vmul.f32 %v1430_v39, %v2155_v30  ;;  %v2175_v14 = vld [vmem:[%s2369_s0 + $0x40] ss:$8 sm:$0x3] }
  0xdb   :  { %v2161_v52 = vsel %vm2133_vm0, %v1879_v45, %v772_v11  ;;  %v923_v20 = vadd.f32 %v921_v10, %v915_v62  ;;  %v1422_v36 = vadd.f32 -3.0, %v874_v37  ;;  %v970_v15 = vmul.f32 %v866_v63, %v866_v63 }
  0xdc   :  { %v777_v33 = vmul.f32 %v2161_v52, %v2161_v52  ;;  %v1419_v46 = vadd.f32 -1.0, %v897_v3  ;;  %v903_v58 = vmul.f32 0.596831, %v2063_v19  ;;  %v2177_v49 = vadd.f32 %v830_v53, %v828_v4 }
  0xdd   :  { %v929_v28 = vadd.f32 %v927_v31, %v923_v20  ;;  %v1424_v56 = vadd.f32 -1.0, %v874_v37  ;;  %vm798_vm1 = vcmp.eq.s32.totalorder %v2145_v51, 2  ;;  %v962_v38 = vmul.f32 %v2166_v43, %v2104_v25 }
  0xde   :  { %v778_v26 = vmul.f32 -0.001358992, %v777_v33  ;;  %v785_v23 = vmul.f32 -0.00019511016, %v777_v33  ;;  %v901_v22 = vmul.f32 0.09947184, %v1419_v46  ;;  %v2185_v6 = vmul.f32 %v2155_v30, %v2155_v30 }
  0xdf   :  { %v933_v16 = vadd.f32 %v931_v13, %v929_v28  ;;  %v907_v1 = vmul.f32 0.14920776, %v2072_v7  ;;  %v958_v12 = vmul.f32 0.11190582, %v956_v27  ;;  %vm795_vm2 = vcmp.eq.s32.totalorder %v2145_v51, 0  ;;  %v1229_v7 = vld [vmem:[%s2373_s4 + $0x28] sm:$0xff] }
  0xe0   :  { %v779_v34 = vadd.f32 0.041655596, %v778_v26  ;;  %v786_v8 = vadd.f32 0.008332121, %v785_v23  ;;  %v2188_v2 = vmul.f32 2.0, %v970_v15  ;;  %v914_v57 = vmul.f32 %v1422_v36, %v2104_v25  ;;  %1259 = vperm.xlu1 %1476, %v1229_v7   ;;  %v1228_v26 = vld [vmem:[%s2373_s4 + $0x20] sm:$0xff] }
  0xe1   :  { %v983_v63 = vmul.f32 %v933_v16, %v2119_v29  ;;  %v905_v5 = vadd.f32 %v903_v58, %v901_v22  ;;  %vm794_vm4 = vcmp.lt.s32.totalorder %v2145_v51, 2  ;;  %v920_v9 = vmul.f32 %v1424_v56, %v2128_v24 }
  0xe2   :  { %v780_v19 = vmul.f32 %v779_v34, %v777_v33  ;;  %v787_v60 = vmul.f32 %v786_v8, %v777_v33  ;;  %v2198_v40 = vsub.f32 1.0, %v2175_v14  ;;  %v952_v41 = vadd.f32 %v950_v59, %v944_v42 }
  0xe3   :  { %v964_v47 = vmul.f32 1.5666815, %v962_v38  ;;  %1041 = vmatpush.msra.mxu2 %v983_v63  ;;  %v909_v48 = vadd.f32 %v907_v1, %v905_v5  ;;  %v475_v53 = vperm.slane %v2175_v14, 0  ;;  %v898_v54 = vmul.f32 3.0, %v2115_v18  ;;  %v995_v38 = vld [vmem:[%s2372_s3] sm:$0xff] }
  0xe4   :  { %v781_v50 = vadd.f32 -0.4999988, %v780_v19  ;;  %v788_v61 = vadd.f32 -0.16666654, %v787_v60  ;;  %v468_v39 = vperm.slane %v2198_v40, 0  ;;  %v926_v62 = vmul.f32 %v2155_v30, %v2104_v25 }
  0xe5   :  { %v916_v37 = vmul.f32 0.13926058, %v914_v57  ;;  %v981_v10 = vmul.f32 %v909_v48, %v2119_v29  ;;  %v922_v42 = vmul.f32 0.104445435, %v920_v9  ;;  %v891_v20 = vmul.f32 0.23873241, %v2018_v44 }
  0xe6   :  { %v782_v0 = vmul.f32 %v781_v50, %v777_v33  ;;  %v789_v32 = vmul.f32 %v788_v61, %v777_v33  ;;  %v974_v33 = vsub.f32 %v2185_v6, %v2188_v2  ;;  %v893_v3 = vmul.f32 0.119366206, %v2054_v35  ;;  %v1231_v44 = vld [vmem:[%s2373_s4 + $0x38] sm:$0xff]  ;;  %v2220_v35 = vld [vmem:[%s2371_s2] sm:$0xff] }
  0xe7   :  { %1042 = vmatpush.msra.mxu2 %v981_v10  ;;  %v960_v36 = vadd.f32 %v958_v12, %v952_v41  ;;  %v1420_v15 = vadd.f32 -1.0, %v898_v54  ;;  %vm1135_vm5 = vcmask 1043456   ;;  %vm1110_vm3 = vcmask 31744   ;;  %1269 = vperm.xlu0 %1475, %v1231_v44   ;;  %v1002_v44 = vld [vmem:[%s2372_s3 + $0x38] sm:$0xff] }
  0xe8   :  { %v783_v4 = vadd.f32 1.0, %v782_v0  ;;  %v790_v59 = vadd.f32 1.0, %v789_v32  ;;  %v895_v46 = vadd.f32 %v893_v3, %v891_v20  ;;  %v924_v34 = vadd.f32 %v922_v42, %v916_v37  ;;  %1254 = vperm.xlu1 %1476, %v1228_v26   ;;  %v989_v32 = vld [vmem:[%s2371_s2 + $0x10] sm:$0xff]  ;;  %v998_v20 = vld [vmem:[%s2372_s3 + $0x18] sm:$0xff]  ;;  %v992_v3 = vld [vmem:[%s2371_s2 + $0x28] sm:$0xff] }
  0xe9   :  { %v928_v8 = vmul.f32 1.0444543, %v926_v62  ;;  %vm792_vm6 = vweird.f32 %v1879_v45  ;;  %vm1003_vm8 = vcmask 261120   ;;  %v834_v22 = vmul.f32 0.5, %v2177_v49  ;;  %v1000_v26 = vld [vmem:[%s2372_s3 + $0x28] sm:$0xff] }
  0xea   :  { %v791_v23 = vmul.f32 %v790_v59, %v2161_v52  ;;  %v799_v27 = vxor.u32 2147483648, %v783_v4  ;;  %v979_v56 = vmul.f32 %v895_v46, %v2119_v29  ;;  %v902_v1 = vmul.f32 0.09947184, %v1420_v15  ;;  %v990_v59 = vld [vmem:[%s2371_s2 + $0x18] sm:$0xff] }
  0xeb   :  { %v904_v19 = vmul.f32 0.596831, %v2141_v21  ;;  %vm490_vm9 = vcmp.le.f32.partialorder %v2030_v17, 4.0  ;;  %v976_v29 = vmul.f32 0.19583519, %v974_v33  ;;  %v966_v12 = vadd.f32 %v964_v47, %v960_v36  ;;  %v1224_v21 = vld [vmem:[%s2373_s4] sm:$0xff] }
  0xec   :  { %v796_v58 = vxor.u32 2147483648, %v791_v23  ;;  %v800_v52 = vsel %vm798_vm1, %v799_v27, %v791_v23  ;;  %1043 = vmatpush.msra.mxu2 %v979_v56  ;;  %v930_v6 = vadd.f32 %v928_v8, %v924_v34  ;;  %v932_v2 = vmul.f32 0.17407572, %v2166_v43  ;;  %v1230_v17 = vld [vmem:[%s2373_s4 + $0x30] sm:$0xff]  ;;  %vm492_vm10 = vmand %vm1847_vm7, %vm490_vm9  ;;  %v988_v43 = vld [vmem:[%s2371_s2 + $0x8] sm:$0xff] }
  0xed   :  { %1431 = vmatmul.msk.f32.vlgmr.msra.gmra.mxu2 %vm1003_vm8, %v995_v38  ;;  %v836_v51 = vadd.f32 2.5, %v834_v22  ;;  %v906_v63 = vadd.f32 %v904_v19, %v902_v1  ;;  %v908_v57 = vmul.f32 0.14920776, %v2155_v30  ;;  %v978_v7 = vadd.f32 %v976_v29, %v966_v12  ;;  %v991_v33 = vld [vmem:[%s2371_s2 + $0x20] sm:$0xff]  ;;  %v1226_v23 = vld [vmem:[%s2373_s4 + $0x10] sm:$0xff]  ;;  %v994_v15 = vld [vmem:[%s2371_s2 + $0x38] sm:$0xff] }
  0xee   :  { %v797_v16 = vsel %vm795_vm2, %v783_v4, %v796_v58  ;;  %v934_v50 = vadd.f32 %v932_v2, %v930_v6  ;;  %v892_v61 = vmul.f32 0.23873241, %v2104_v25  ;;  %v894_v9 = vmul.f32 0.119366206, %v2128_v24  ;;  %v1225_v25 = vld [vmem:[%s2373_s4 + $0x8] sm:$0xff]  ;;  %v993_v27 = vld [vmem:[%s2371_s2 + $0x30] sm:$0xff] }
  0xef   :  { %v801_v45 = vsel %vm794_vm4, %v797_v16, %v800_v52  ;;  %1264 = vperm.xlu0 %1475, %v1230_v17   ;;  %v910_v30 = vadd.f32 %v908_v57, %v906_v63  ;;  %v476_v54 = vperm.slane %v2175_v14, 1  ;;  %v469_v37 = vperm.slane %v2198_v40, 1  ;;  %v1001_v36 = vld [vmem:[%s2372_s3 + $0x30] sm:$0xff] }
  0xf0   :  { %v802_v60 = vsel %vm792_vm6, nan, %v801_v45  ;;  %1234 = vperm.xlu1 %1476, %v1224_v21   ;;  %v896_v0 = vadd.f32 %v894_v9, %v892_v61  ;;  %vm1311_vm7 = vcmask 523264   ;;  %vm1358_vm11 = vcmask 1040384  }
  0xf1   :  { %v804_v49 = vmul.f32 0.5, %v802_v60 }
  0xf3   :  { %v806_v5 = vadd.f32 0.5, %v804_v49 }
  0xf5   :  { %v808_v41 = vsel %vm492_vm10, %v806_v5, 0.0  ;;  %1432 = vmatmul.msk.f32.gmra.mxu2 %vm1003_vm8, %v996_v55 }
  0xf6   :  { %v838_v47 = vmul.f32 %v836_v51, %v808_v41 }
  0xf7   :  { %v444_v11 = vpop.f32.mrf.mxu0  ;;  %1239 = vperm.xlu0 %1475, %v1225_v25  }
  0xf8   :  { %v479_v31 = vmul.f32 %v475_v53, %v444_v11  ;;  %v472_v18 = vmul.f32 %v468_v39, %v444_v11  ;;  %v986_v48 = vmul.f32 %v978_v7, %v838_v47  ;;  %v984_v53 = vmul.f32 %v934_v50, %v838_v47  ;;  %v997_v39 = vld [vmem:[%s2372_s3 + $0x10] sm:$0xff] }
  0xf9   :  { %v982_v24 = vmul.f32 %v910_v30, %v838_v47  ;;  %v980_v11 = vmul.f32 %v896_v0, %v838_v47 }
  0xfa   :  { %v483_v13 = vrot.slane %v479_v31, 4  ;;  %1081 = vmatpush.msra.mxu3 %v986_v48 }
  0xfc   :  { %v487_v28 = vadd.f32 %v483_v13, %v472_v18  ;;  %1082 = vmatpush.msra.mxu3 %v984_v53  ;;  %v999_v18 = vld [vmem:[%s2372_s3 + $0x20] sm:$0xff]  ;;  %v1227_v13 = vld [vmem:[%s2373_s4 + $0x18] sm:$0xff] }
  0xfd   :  { %1433 = vmatmul.msk.f32.gmra.mxu2 %vm1003_vm8, %v997_v39  ;;  %1249 = vperm.xlu2 %1477, %v1227_v13  }
  0xfe   :  { %1447 = vmatpush.msk.msrb.mxu0 %vm1135_vm5, %v487_v28  ;;  %1083 = vmatpush.msra.mxu3 %v982_v24  ;;  %v1305_v28 = vld [vmem:[%s2375_s6] sm:$0x3] }
  0xff   :  { %1448 = vmatmul.msk.f32.vlgmr.msrb.gmra.mxu0 %vm1110_vm3, %v2220_v35 }
 0x100   :  { %1084 = vmatpush.msra.mxu3 %v980_v11 }
 0x101   :  { %1439 = vmatmul.msk.f32.vlgmr.msra.gmra.mxu3 %vm1003_vm8, %v995_v38 }
 0x105   :  { %1434 = vmatmul.msk.f32.gmra.mxu2 %vm1003_vm8, %v998_v20  ;;  %1244 = vperm.xlu2 %1477, %v1226_v23  }
 0x107   :  { %1449 = vmatmul.msk.f32.gmra.mxu0 %vm1110_vm3, %v988_v43 }
 0x109   :  { %1440 = vmatmul.msk.f32.gmra.mxu3 %vm1003_vm8, %v996_v55 }
 0x10a   :  { %v464_v62 = vpop.f32.mrf.mxu1 }
 0x10b   :  { %v480_v10 = vmul.f32 %v476_v54, %v464_v62  ;;  %v473_v31 = vmul.f32 %v469_v37, %v464_v62 }
 0x10d   :  { %v484_v4 = vrot.slane %v480_v10, 4  ;;  %1435 = vmatmul.msk.f32.gmra.mxu2 %vm1003_vm8, %v999_v18  ;;  %1308 = vperm.xlu2 %1477, %v1305_v28  }
 0x10f   :  { %1450 = vmatmul.msk.f32.gmra.mxu0 %vm1110_vm3, %v989_v32  ;;  %v488_v42 = vadd.f32 %v484_v4, %v473_v31 }
 0x111   :  { %1456 = vmatpush.msk.msrb.mxu1 %vm1135_vm5, %v488_v42  ;;  %1441 = vmatmul.msk.f32.gmra.mxu3 %vm1003_vm8, %v997_v39 }
 0x112   :  { %1457 = vmatmul.msk.f32.vlgmr.msrb.gmra.mxu1 %vm1110_vm3, %v2220_v35 }
 0x115   :  { %1436 = vmatmul.msk.f32.gmra.mxu2 %vm1003_vm8, %v1000_v26 }
 0x117   :  { %1451 = vmatmul.msk.f32.gmra.mxu0 %vm1110_vm3, %v990_v59 }
 0x119   :  { %1442 = vmatmul.msk.f32.gmra.mxu3 %vm1003_vm8, %v998_v20 }
 0x11a   :  { %1458 = vmatmul.msk.f32.gmra.mxu1 %vm1110_vm3, %v988_v43 }
 0x11d   :  { %1437 = vmatmul.msk.f32.gmra.mxu2 %vm1003_vm8, %v1001_v36 }
 0x11f   :  { %1452 = vmatmul.msk.f32.gmra.mxu0 %vm1110_vm3, %v991_v33 }
 0x121   :  { %1443 = vmatmul.msk.f32.gmra.mxu3 %vm1003_vm8, %v999_v18 }
 0x122   :  { %1459 = vmatmul.msk.f32.gmra.mxu1 %vm1110_vm3, %v989_v32 }
 0x125   :  { %1438 = vmatmul.msk.f32.gmra.mxu2 %vm1003_vm8, %v1002_v44 }
 0x127   :  { %1453 = vmatmul.msk.f32.gmra.mxu0 %vm1110_vm3, %v992_v3 }
 0x129   :  { %1444 = vmatmul.msk.f32.gmra.mxu3 %vm1003_vm8, %v1000_v26 }
 0x12a   :  { %1460 = vmatmul.msk.f32.gmra.mxu1 %vm1110_vm3, %v990_v59 }
 0x12f   :  { %1454 = vmatmul.msk.f32.gmra.mxu0 %vm1110_vm3, %v993_v27 }
 0x131   :  { %1445 = vmatmul.msk.f32.gmra.mxu3 %vm1003_vm8, %v1001_v36 }
 0x132   :  { %1461 = vmatmul.msk.f32.gmra.mxu1 %vm1110_vm3, %v991_v33 }
 0x137   :  { %1455 = vmatmul.msk.f32.gmra.mxu0 %vm1110_vm3, %v994_v15 }
 0x139   :  { %1446 = vmatmul.msk.f32.gmra.mxu3 %vm1003_vm8, %v1002_v44 }
 0x13a   :  { %1462 = vmatmul.msk.f32.gmra.mxu1 %vm1110_vm3, %v992_v3 }
 0x142   :  { %1463 = vmatmul.msk.f32.gmra.mxu1 %vm1110_vm3, %v993_v27 }
 0x14a   :  { %1464 = vmatmul.msk.f32.gmra.mxu1 %vm1110_vm3, %v994_v15 }
 0x152   :  { %v1260_v5 = vpop.permute.xlu1 %1259 }
 0x157   :  { %v2350_v61 = vpop.permute.xlu2 %1249 }
 0x159   :  { %v1270_v57 = vpop.permute.xlu0 %1269 }
 0x15a   :  { %v1255_v25 = vpop.permute.xlu1 %1254 }
 0x15f   :  { %v1245_v10 = vpop.permute.xlu2 %1244 }
 0x161   :  { %v1265_v55 = vpop.permute.xlu0 %1264 }
 0x162   :  { %v1235_v13 = vpop.permute.xlu1 %1234 }
 0x169   :  { %v1240_v20 = vpop.permute.xlu0 %1239 }
 0x170   :  { %v1045_v35 = vpop.f32.mrf.mxu2 }
 0x178   :  { %v1048_v34 = vpop.f32.mrf.mxu2 }
 0x17c   :  { %v1159_v46 = vpop.f32.mrf.mxu0 }
 0x17d   :  { %v1160_v52 = vadd.f32 %v1159_v46, %v1045_v35 }
 0x17f   :  { %v1272_v27 = vadd.f32 %v1235_v13, %v1160_v52 }
 0x180   :  { %v1051_v56 = vpop.f32.mrf.mxu2 }
 0x184   :  { %v1162_v58 = vpop.f32.mrf.mxu0  ;;  %v1086_v16 = vpop.f32.mrf.mxu3 }
 0x185   :  { %v1163_v31 = vadd.f32 %v1162_v58, %v1048_v34 }
 0x187   :  { %v1274_v26 = vadd.f32 %v1240_v20, %v1163_v31 }
 0x188   :  { %v1054_v19 = vpop.f32.mrf.mxu2 }
 0x18c   :  { %v1165_v8 = vpop.f32.mrf.mxu0  ;;  %v2342_v29 = vpop.f32.mrf.mxu3 }
 0x18d   :  { %v1166_v37 = vadd.f32 %v1165_v8, %v1051_v56 }
 0x18f   :  { %v1200_v22 = vpop.f32.mrf.mxu1  ;;  %v1276_v18 = vadd.f32 %v1245_v10, %v1166_v37 }
 0x190   :  { %v2340_v1 = vadd.f32 %v1200_v22, %v1086_v16  ;;  %v1057_v12 = vpop.f32.mrf.mxu2 }
 0x194   :  { %v1168_v38 = vpop.f32.mrf.mxu0  ;;  %v2346_v6 = vpop.f32.mrf.mxu3 }
 0x195   :  { %v1169_v11 = vadd.f32 %v1168_v38, %v1054_v19 }
 0x197   :  { %v2344_v60 = vpop.f32.mrf.mxu1  ;;  %v1278_v4 = vadd.f32 %v2350_v61, %v1169_v11 }
 0x198   :  { %v1060_v21 = vpop.f32.mrf.mxu2 }
 0x19c   :  { %v1171_v45 = vpop.f32.mrf.mxu0  ;;  %v1095_v17 = vpop.f32.mrf.mxu3 }
 0x19d   :  { %v1172_v24 = vadd.f32 %v1171_v45, %v1057_v12  ;;  %v1304_v12 = vld [vmem:[%s2374_s5] sm:$0x3]  ;;  %s1549_s5 = smov [#allocation2]  }
 0x19e   :  { %s1379_s22 = sshll.u32 %s1549_s5, 4  ;;  %s1380_s22 = int_to_ptr.vmem [resolvable:$true] %s1379_s22 }
 0x19f   :  { %v2348_v2 = vpop.f32.mrf.mxu1  ;;  %v1280_v62 = vadd.f32 %v1255_v25, %v1172_v24 }
 0x1a0   :  { %v1063_v43 = vpop.f32.mrf.mxu2  ;;  %v1207_v19 = vadd.f32 %v2348_v2, %v2346_v6 }
 0x1a2   :  { %v1277_v6 = vadd.f32 %v1245_v10, %v1207_v19 }
 0x1a4   :  { %v1174_v49 = vpop.f32.mrf.mxu0  ;;  %v1098_v7 = vpop.f32.mrf.mxu3 }
 0x1a5   :  { %v1175_v48 = vadd.f32 %v1174_v49, %v1060_v21  ;;  %v1204_v21 = vadd.f32 %v2344_v60, %v2342_v29 }
 0x1a7   :  { %v1209_v51 = vpop.f32.mrf.mxu1  ;;  %v1282_v39 = vadd.f32 %v1260_v5, %v1175_v48  ;;  %v1369_v48 = vlaneseq }
 0x1a8   :  { %v1066_v47 = vpop.f32.mrf.mxu2  ;;  %v1210_v16 = vadd.f32 %v1209_v51, %v1095_v17 }
 0x1a9   :  { %vm1371_vm12 = vcmp.lt.s32.totalorder %v1369_v48, 256 }
 0x1aa   :  { %v1279_v17 = vadd.f32 %v2350_v61, %v1210_v16  ;;  %v1309_v61 = vpop.permute.xlu2 %1308 }
 0x1ac   :  { %v1177_v63 = vpop.f32.mrf.mxu0  ;;  %v1101_v30 = vpop.f32.mrf.mxu3 }
 0x1ad   :  { %v1178_v41 = vadd.f32 %v1177_v63, %v1063_v43  ;;  %v1275_v63 = vadd.f32 %v1240_v20, %v1204_v21 }
 0x1af   :  { %v1212_v50 = vpop.f32.mrf.mxu1  ;;  %v1284_v32 = vadd.f32 %v1265_v55, %v1178_v41 }
 0x1b0   :  { %v1213_v34 = vadd.f32 %v1212_v50, %v1098_v7 }
 0x1b2   :  { %v1281_v45 = vadd.f32 %v1255_v25, %v1213_v34 }
 0x1b4   :  { %v1180_v9 = vpop.f32.mrf.mxu0  ;;  %v1104_v59 = vpop.f32.mrf.mxu3 }
 0x1b5   :  { %v1181_v0 = vadd.f32 %v1180_v9, %v1066_v47 }
 0x1b7   :  { %v1215_v53 = vpop.f32.mrf.mxu1  ;;  %v1286_v54 = vadd.f32 %v1270_v57, %v1181_v0 }
 0x1b8   :  { %v1216_v46 = vadd.f32 %v1215_v53, %v1101_v30 }
 0x1b9   :  { %1482 = vtanh.f32 %v1286_v54 }
 0x1ba   :  { %1484 = vtanh.f32 %v1284_v32  ;;  %v1283_v22 = vadd.f32 %v1260_v5, %v1216_v46  ;;  %v1273_v5 = vadd.f32 %v1235_v13, %v2340_v1 }
 0x1bb   :  { %1486 = vtanh.f32 %v1282_v39 }
 0x1bc   :  { %1488 = vtanh.f32 %v1280_v62  ;;  %v1107_v44 = vpop.f32.mrf.mxu3 }
 0x1bd   :  { %1490 = vtanh.f32 %v1278_v4 }
 0x1be   :  { %1492 = vtanh.f32 %v1276_v18 }
 0x1bf   :  { %v1218_v42 = vpop.f32.mrf.mxu1  ;;  %v1483_v33 = vpop.eup %1482  ;;  %1494 = vtanh.f32 %v1274_v26 }
 0x1c0   :  { %1323 = vmatpush.msrb.mxu2 %v1483_v33  ;;  %v1485_v3 = vpop.eup %1484  ;;  %v1219_v36 = vadd.f32 %v1218_v42, %v1104_v59  ;;  %1496 = vtanh.f32 %v1272_v27 }
 0x1c1   :  { %v1487_v23 = vpop.eup %1486 }
 0x1c2   :  { %1324 = vmatpush.msrb.mxu2 %v1485_v3  ;;  %v1489_v15 = vpop.eup %1488  ;;  %v1285_v8 = vadd.f32 %v1265_v55, %v1219_v36 }
 0x1c3   :  { %v1491_v58 = vpop.eup %1490 }
 0x1c4   :  { %1325 = vmatpush.msrb.mxu2 %v1487_v23  ;;  %v1493_v38 = vpop.eup %1492 }
 0x1c5   :  { %v1495_v52 = vpop.eup %1494 }
 0x1c6   :  { %1326 = vmatpush.msrb.mxu2 %v1489_v15  ;;  %v1497_v49 = vpop.eup %1496 }
 0x1c7   :  { %v1221_v28 = vpop.f32.mrf.mxu1 }
 0x1c8   :  { %v1222_v35 = vadd.f32 %v1221_v28, %v1107_v44  ;;  %1327 = vmatpush.msrb.mxu2 %v1491_v58 }
 0x1ca   :  { %v1287_v56 = vadd.f32 %v1270_v57, %v1222_v35  ;;  %1328 = vmatpush.msrb.mxu2 %v1493_v38 }
 0x1cc   :  { %1498 = vtanh.f32 %v1287_v56  ;;  %1329 = vmatpush.msrb.mxu2 %v1495_v52 }
 0x1cd   :  { %1500 = vtanh.f32 %v1285_v8 }
 0x1ce   :  { %1502 = vtanh.f32 %v1283_v22  ;;  %1330 = vmatpush.msrb.mxu2 %v1497_v49 }
 0x1cf   :  { %1465 = vmatmul.msk.f32.vlgmr.msrb.gmra.mxu2 %vm1311_vm7, %v1304_v12  ;;  %1504 = vtanh.f32 %v1281_v45 }
 0x1d0   :  { %1506 = vtanh.f32 %v1279_v17 }
 0x1d1   :  { %1508 = vtanh.f32 %v1277_v6 }
 0x1d2   :  { %v1499_v51 = vpop.eup %1498  ;;  %1510 = vtanh.f32 %v1275_v63 }
 0x1d3   :  { %1343 = vmatpush.msrb.mxu3 %v1499_v51  ;;  %v1501_v2 = vpop.eup %1500  ;;  %1512 = vtanh.f32 %v1273_v5 }
 0x1d4   :  { %v1503_v57 = vpop.eup %1502 }
 0x1d5   :  { %1344 = vmatpush.msrb.mxu3 %v1501_v2  ;;  %v1505_v29 = vpop.eup %1504 }
 0x1d6   :  { %v1507_v60 = vpop.eup %1506 }
 0x1d7   :  { %1345 = vmatpush.msrb.mxu3 %v1503_v57  ;;  %v1509_v43 = vpop.eup %1508 }
 0x1d8   :  { %v1511_v7 = vpop.eup %1510 }
 0x1d9   :  { %1346 = vmatpush.msrb.mxu3 %v1505_v29  ;;  %v1513_v50 = vpop.eup %1512 }
 0x1db   :  { %1347 = vmatpush.msrb.mxu3 %v1507_v60 }
 0x1dd   :  { %1348 = vmatpush.msrb.mxu3 %v1509_v43 }
 0x1df   :  { %1349 = vmatpush.msrb.mxu3 %v1511_v7 }
 0x1e1   :  { %1350 = vmatpush.msrb.mxu3 %v1513_v50 }
 0x1e2   :  { %1466 = vmatmul.msk.f32.vlgmr.msrb.gmra.mxu3 %vm1311_vm7, %v1304_v12 }
 0x252   :  { %v1332_v9 = vpop.f32.mrf.mxu2 }
 0x253   :  { %v1333_v41 = vadd.f32 %v1332_v9, %v1309_v61 }
 0x255   :  { %1362 = vst [vmem:[#allocation1] sm:$0xff] %v1333_v41 }
 0x265   :  { %v1352_v1 = vpop.f32.mrf.mxu3 }
 0x266   :  { %v1353_v55 = vadd.f32 %v1352_v1, %v1309_v61 }
 0x268   :  { %1363 = vst [vmem:[#allocation1 + $0x9] sm:$0xff] %v1353_v55  ;;  %v1357_v47 = vrot.slane %v1353_v55, 7 }
 0x26a   :  { %v1359_v30 = vsel %vm1358_vm11, %v1333_v41, %v1357_v47 }
 0x26b   :  { %v1361_v0 = vmul.f32 %v1359_v30, %v2198_v40 }
 0x26f   :  { %v1365_v53 = vld [vmem:[#allocation1 + $0x1] ss:$9 sm:$0xff] }
 0x270   :  { %v1367_v25 = vmul.f32 %v2175_v14, %v1365_v53 }
 0x272   :  { %v1368_v24 = vadd.f32 %v1367_v25, %v1361_v0 }
 0x274   :  { %1373 = vst.msk [vmem:[#allocation2] sm:$0x3] %vm1371_vm12, %v1368_v24 }
 0x275   :  { %1384 = dma.vmem_to_hbm [thread:$0]  %s1380_s22, 32, %s1382_s24, [#allocation3]  }
 0x276   :  { %1540 = dma.done.wait [#allocation3], 32  }
 0x277   :  { %1541 = vsyncadd [#allocation3], 4294967264 }
 0x278   :  { %1389 = vsyncpa [#allocation3], 1 }

</bundles_post_ra>
